<compile_context>
chip_gen: v7x
topology: tpu7x:2x2x1
jax: 0.10.0
libtpu: 0.0.40
codegen_flags: <defaults>
</compile_context>

<pallas_src>
import functools

import jax
import jax.numpy as jnp
from jax import lax
from jax.experimental import pallas as pl
from jax.experimental.pallas import tpu as pltpu

BN_EPS = 1e-5
LANES = 128
VMEM_LIMIT = 32 * 1024 * 1024  # explicit, safe on v5e/v6e/v7x


def _round_up(x, m):
    return (x + m - 1) // m * m


# ----------------------------- conv kernels -------------------------------- #
def _conv_relu_kernel(p_ref, w_ref, b_ref, o_ref):
    # o = relu(patches @ W + b), one M-tile per grid step.
    y = jnp.dot(p_ref[...], w_ref[...], preferred_element_type=jnp.float32)
    o_ref[...] = jnp.maximum(y + b_ref[...], 0.0)


def _conv_bn_relu_fused_kernel(p_ref, w_ref, b_ref, g_ref, be_ref, o_ref,
                               *, m_valid, m_total):
    # Single-tile fused Conv + training-mode BatchNorm + ReLU (grid == (1,)):
    # GEMM, batch statistics, affine fold, normalize — all resident in VMEM.
    b_row = b_ref[...]
    y = jnp.dot(p_ref[...], w_ref[...],
                preferred_element_type=jnp.float32) + b_row
    # Padded (all-zero) patch rows contribute exactly y == bias; correct the
    # raw moments with the static pad count instead of a mask input.
    n_pad = jnp.float32(m_total - m_valid)
    ssum = jnp.sum(y, axis=0, keepdims=True) - n_pad * b_row
    ssq = jnp.sum(y * y, axis=0, keepdims=True) - n_pad * (b_row * b_row)
    inv_m = jnp.float32(1.0 / m_valid)
    mean = ssum * inv_m
    var = jnp.maximum(ssq * inv_m - mean * mean, 0.0)
    scale = lax.rsqrt(var + BN_EPS) * g_ref[...]
    shift = be_ref[...] - mean * scale
    o_ref[...] = jnp.maximum(y * scale + shift, 0.0)


def _gemm_bias_stats_kernel(p_ref, w_ref, b_ref, y_ref, s_ref, q_ref):
    # Multi-tile fallback pass 1: y = patches @ W + b (stored bf16), plus raw
    # per-channel sum / sum-of-squares accumulated across the M grid axis.
    @pl.when(pl.program_id(0) == 0)
    def _():
        s_ref[...] = jnp.zeros_like(s_ref)
        q_ref[...] = jnp.zeros_like(q_ref)

    y = jnp.dot(p_ref[...], w_ref[...],
                preferred_element_type=jnp.float32) + b_ref[...]
    y_ref[...] = y.astype(y_ref.dtype)
    s_ref[...] += jnp.sum(y, axis=0, keepdims=True)
    q_ref[...] += jnp.sum(y * y, axis=0, keepdims=True)


def _bn_relu_kernel(y_ref, sc_ref, sh_ref, o_ref):
    # Multi-tile fallback pass 2: y*scale + shift (affine pre-folded), ReLU.
    o_ref[...] = jnp.maximum(
        y_ref[...].astype(jnp.float32) * sc_ref[...] + sh_ref[...], 0.0)


def _im2col_nhwc(x, kh, kw, stride, pad):
    # x: (N, H, W, C) NHWC -> patches (N*Ho*Wo, kh*kw*C); feature order
    # (kh, kw, C) matches w.transpose(2, 3, 1, 0).reshape(kh*kw*C_in, C_out).
    # TODO(synk): patches materialize in HBM; in-kernel im2col only matters at
    #             production batch/image sizes.
    N, H, W, C = x.shape
    xp = jnp.pad(x, ((0, 0), (pad, pad), (pad, pad), (0, 0)))
    Ho = (H + 2 * pad - kh) // stride + 1
    Wo = (W + 2 * pad - kw) // stride + 1
    cols = []
    for i in range(kh):
        for j in range(kw):
            cols.append(xp[:, i:i + stride * Ho:stride, j:j + stride * Wo:stride, :])
    p = jnp.stack(cols, axis=3)               # (N, Ho, Wo, kh*kw, C)
    p = p.reshape(N * Ho * Wo, kh * kw * C)
    return p, Ho, Wo


def conv2d_relu_nhwc(x, w, b, stride, pad, bn=None):
    """PyTorch-equivalent Conv2d (+ optional training-mode BN) + ReLU, NHWC."""
    N = x.shape[0]
    C_out, C_in, kh, kw = w.shape
    patches, Ho, Wo = _im2col_nhwc(x, kh, kw, stride, pad)
    M, K = patches.shape

    TM = min(512, _round_up(M, 16))           # M-tile (raised cap, VMEM-safe)
    M_pad = _round_up(M, TM)
    CP = _round_up(C_out, LANES)              # lane-dense output columns

    p_pad = jnp.pad(patches.astype(jnp.bfloat16), ((0, M_pad - M), (0, 0)))
    w2d = w.transpose(2, 3, 1, 0).reshape(kh * kw * C_in, C_out)
    w_pad = jnp.pad(w2d.astype(jnp.bfloat16), ((0, 0), (0, CP - C_out)))
    b_pad = jnp.pad(b.reshape(1, C_out).astype(jnp.float32),
                    ((0, 0), (0, CP - C_out)))

    grid = (M_pad // TM,)
    p_spec = pl.BlockSpec((TM, K), lambda i: (i, 0))
    w_spec = pl.BlockSpec((K, CP), lambda i: (0, 0))
    v_spec = pl.BlockSpec((1, CP), lambda i: (0, 0))   # bias / per-channel rows
    o_spec = pl.BlockSpec((TM, CP), lambda i: (i, 0))

    if bn is None:
        y = pl.pallas_call(
            _conv_relu_kernel,
            out_shape=jax.ShapeDtypeStruct((M_pad, CP), jnp.float32),
            grid=grid,
            in_specs=[p_spec, w_spec, v_spec],
            out_specs=o_spec,
            compiler_params=pltpu.CompilerParams(
                dimension_semantics=("parallel",),
                vmem_limit_bytes=VMEM_LIMIT),
        )(p_pad, w_pad, b_pad)
    else:
        gamma, beta = bn
        g_pad = jnp.pad(gamma.reshape(1, C_out).astype(jnp.float32),
                        ((0, 0), (0, CP - C_out)))
        be_pad = jnp.pad(beta.reshape(1, C_out).astype(jnp.float32),
                         ((0, 0), (0, CP - C_out)))

        if M_pad == TM:
            # Single-tile grid: fully fused conv + BN + ReLU, one pallas_call.
            y = pl.pallas_call(
                functools.partial(_conv_bn_relu_fused_kernel,
                                  m_valid=M, m_total=M_pad),
                out_shape=jax.ShapeDtypeStruct((M_pad, CP), jnp.float32),
                grid=grid,
                in_specs=[p_spec, w_spec, v_spec, v_spec, v_spec],
                out_specs=o_spec,
                compiler_params=pltpu.CompilerParams(
                    dimension_semantics=("parallel",),
                    vmem_limit_bytes=VMEM_LIMIT),
            )(p_pad, w_pad, b_pad, g_pad, be_pad)
        else:
            # Large-M fallback: two-pass BN, bf16 intermediate, mask-free
            # host-corrected statistics, pre-folded affine.
            y_raw, ssum, ssq = pl.pallas_call(
                _gemm_bias_stats_kernel,
                out_shape=(jax.ShapeDtypeStruct((M_pad, CP), jnp.bfloat16),
                           jax.ShapeDtypeStruct((1, CP), jnp.float32),
                           jax.ShapeDtypeStruct((1, CP), jnp.float32)),
                grid=grid,
                in_specs=[p_spec, w_spec, v_spec],
                out_specs=(o_spec, v_spec, v_spec),
                compiler_params=pltpu.CompilerParams(
                    dimension_semantics=("arbitrary",),   # stats over M axis
                    vmem_limit_bytes=VMEM_LIMIT),
            )(p_pad, w_pad, b_pad)

            # Padded rows produced exactly y == bias; subtract their moments.
            n_pad = jnp.float32(M_pad - M)
            ssum = ssum - n_pad * b_pad
            ssq = ssq - n_pad * (b_pad * b_pad)
            inv_m = jnp.float32(1.0 / M)
            mean = ssum * inv_m
            var = jnp.maximum(ssq * inv_m - mean * mean, 0.0)
            scale = lax.rsqrt(var + BN_EPS) * g_pad
            shift = be_pad - mean * scale

            y = pl.pallas_call(
                _bn_relu_kernel,
                out_shape=jax.ShapeDtypeStruct((M_pad, CP), jnp.float32),
                grid=grid,
                in_specs=[o_spec, v_spec, v_spec],
                out_specs=pl.BlockSpec((TM, CP), lambda i: (i, 0)),
                compiler_params=pltpu.CompilerParams(
                    dimension_semantics=("parallel",),
                    vmem_limit_bytes=VMEM_LIMIT),
            )(y_raw, scale, shift)

    # Drop M/channel padding; stay NHWC (no transpose between layers).
    return y[:M, :C_out].reshape(N, Ho, Wo, C_out)


# ------------------------------ CfC kernel --------------------------------- #
def _cfc_rnn_kernel(x_ref, wx_ref, bx_ref, wh_ref, hT_ref, *, T, Bp):
    H = hT_ref.shape[1]
    # Hoisted input-side projection for all T: one (T*Bp, D) x (D, 4H) GEMM.
    xp = jnp.dot(x_ref[...], wx_ref[...],
                 preferred_element_type=jnp.float32) + bx_ref[...]   # (T*Bp, 4H)

    h = jnp.zeros((Bp, H), jnp.float32)
    for t in range(T):                       # T is tiny & static: full unroll
        g = xp[t * Bp:(t + 1) * Bp, :] + jnp.dot(
            h.astype(jnp.bfloat16), wh_ref[...],
            preferred_element_type=jnp.float32)                      # (Bp, 4H)
        ff1 = jnp.tanh(g[:, 0:H])
        ff2 = jnp.tanh(g[:, H:2 * H])
        # ts == 1.0 and t_a/t_b weights are pre-summed -> single sigmoid slice,
        # no cross-gate add in the serial loop.
        t_interp = jax.nn.sigmoid(g[:, 2 * H:3 * H])
        h = ff1 * (1.0 - t_interp) + t_interp * ff2                  # f32 math
    hT_ref[...] = h


def cfc_rnn_last_hidden(x_seq, params):
    # x_seq: (B, T, D)  ->  final hidden state (B, H).  h0 = zeros.
    B, T, D = x_seq.shape
    H = params["w1h"].shape[0]
    Bp = _round_up(B, 16)                     # full bf16 sublane tile for h

    # Fused gate weights [ff1 | ff2 | (t_a + t_b) | 0]  ->  4H = 128 lanes.
    # (folding t_a + t_b is exact only because ts == 1.0)
    zx = jnp.zeros_like(params["w1x"])
    zh = jnp.zeros_like(params["w1h"])
    zb = jnp.zeros_like(params["b1"])
    wx = jnp.concatenate(
        [params["w1x"], params["w2x"], params["wax"] + params["wbx"], zx], axis=1)
    wh = jnp.concatenate(
        [params["w1h"], params["w2h"], params["wah"] + params["wbh"], zh], axis=1)
    bx = jnp.concatenate(
        [params["b1"], params["b2"], params["ba"] + params["bb"], zb], axis=1)

    x_tb = jnp.pad(x_seq, ((0, Bp - B), (0, 0), (0, 0)))   # (Bp, T, D)
    x_tb = x_tb.transpose(1, 0, 2).reshape(T * Bp, D)      # time-major rows

    out = pl.pallas_call(
        functools.partial(_cfc_rnn_kernel, T=T, Bp=Bp),
        out_shape=jax.ShapeDtypeStruct((Bp, H), jnp.float32),
        compiler_params=pltpu.CompilerParams(vmem_limit_bytes=VMEM_LIMIT),
    )(x_tb.astype(jnp.bfloat16),
      wx.astype(jnp.bfloat16),
      bx.astype(jnp.float32),
      wh.astype(jnp.bfloat16))
    return out[:B]


# ------------------------------- full model -------------------------------- #
def lnn_forward(x, params, *, sequence_length, ncp_input_size, num_classes):
    x = x.transpose(0, 2, 3, 1)                            # NCHW -> NHWC once
    x = conv2d_relu_nhwc(x, params["w_c1"], params["b_c1"], stride=1, pad=0)
    x = conv2d_relu_nhwc(x, params["w_c2"], params["b_c2"], stride=2, pad=2,
                         bn=(params["g_bn2"], params["be_bn2"]))
    x = conv2d_relu_nhwc(x, params["w_c3"], params["b_c3"], stride=2, pad=2)
    x = conv2d_relu_nhwc(x, params["w_c4"], params["b_c4"], stride=2, pad=2,
                         bn=(params["g_bn4"], params["be_bn4"]))
    # F.max_pool2d(..., (2, 2)) — trivially small; plain-JAX glue in NHWC.
    N, Hh, Ww, C = x.shape
    x = x.reshape(N, Hh // 2, 2, Ww // 2, 2, C).max(axis=(2, 4))
    # Back to PyTorch NCHW memory order for the .view(-1, seq_len, ncp_input).
    x = x.transpose(0, 3, 1, 2).reshape(-1, sequence_length, ncp_input_size)
    hT = cfc_rnn_last_hidden(x, params)
    # out[:, -1, :] of the wired CfC == motor neurons (first num_classes units).
    return hT[:, :num_classes]


# ------------------------------ parameters --------------------------------- #
def init_params(key, ncp_input_size, hidden_size):
    ks = jax.random.split(key, 24)

    def u(k, shape, fan_in):
        bound = 1.0 / jnp.sqrt(jnp.float32(fan_in))
        return jax.random.uniform(k, shape, jnp.float32, -bound, bound)

    p = {}
    p["w_c1"] = u(ks[0], (16, 1, 3, 3), 1 * 9);     p["b_c1"] = u(ks[1], (16,), 1 * 9)
    p["w_c2"] = u(ks[2], (32, 16, 3, 3), 16 * 9);   p["b_c2"] = u(ks[3], (32,), 16 * 9)
    p["g_bn2"] = jnp.ones((32,), jnp.float32);      p["be_bn2"] = jnp.zeros((32,), jnp.float32)
    p["w_c3"] = u(ks[4], (64, 32, 5, 5), 32 * 25);  p["b_c3"] = u(ks[5], (64,), 32 * 25)
    p["w_c4"] = u(ks[6], (128, 64, 5, 5), 64 * 25); p["b_c4"] = u(ks[7], (128,), 64 * 25)
    p["g_bn4"] = jnp.ones((128,), jnp.float32);     p["be_bn4"] = jnp.zeros((128,), jnp.float32)

    D, H = ncp_input_size, hidden_size
    fan = D + H
    i = 8
    for n in ("1", "2", "a", "b"):
        p[f"w{n}x"] = u(ks[i], (D, H), fan); i += 1
        p[f"w{n}h"] = u(ks[i], (H, H), fan); i += 1
        p[f"b{n}"] = u(ks[i], (1, H), fan); i += 1
    return p


if __name__ == "__main__":
    # 16x16 single-channel images; conv stack: 16 -> 14 -> 8 -> 4 -> 2 -> pool
    # -> 1, giving 128 features/image = sequence_length(4) * ncp_input_size(32).
    NCP_INPUT, HIDDEN, NUM_CLASSES, SEQ_LEN = 32, 32, 8, 4
    key = jax.random.PRNGKey(0)
    kx, kp = jax.random.split(key)
    x = jax.random.normal(kx, (2, 1, 16, 16), jnp.float32)   # NCHW, like PyTorch
    params = init_params(kp, NCP_INPUT, HIDDEN)

    fwd = jax.jit(functools.partial(
        lnn_forward,
        sequence_length=SEQ_LEN,
        ncp_input_size=NCP_INPUT,
        num_classes=NUM_CLASSES))

    out = fwd(x, params)
    jax.block_until_ready(out)
    assert out.shape == (2, NUM_CLASSES), out.shape
    assert bool(jnp.all(jnp.isfinite(out)))
    print("KERNEL_OK")
</pallas_src>

<mosaic_0001>
module attributes {stable_mosaic.version = 11 : i64} {
  func.func @_conv_relu_kernel(%arg0: i32, %arg1: memref<400x9xbf16, #tpu.memory_space<vmem>>, %arg2: memref<9x128xbf16, #tpu.memory_space<vmem>>, %arg3: memref<1x128xf32, #tpu.memory_space<vmem>>, %arg4: memref<400x128xf32, #tpu.memory_space<vmem>>) attributes {dimension_semantics = [#tpu.dimension_semantics<parallel>], iteration_bounds = array<i64: 1>, scalar_prefetch = 0 : i64, scratch_operands = 0 : i64, tpu.core_type = #tpu.core_type<tc>, window_params = [{transform_indices = @transform_0, window_bounds = array<i64: 400, 9>}, {pipeline_mode = #tpu.pipeline_mode<synchronous>, transform_indices = @transform_1, window_bounds = array<i64: 9, 128>}, {pipeline_mode = #tpu.pipeline_mode<synchronous>, transform_indices = @transform_2, window_bounds = array<i64: 1, 128>}, {transform_indices = @transform_3, window_bounds = array<i64: 400, 128>}]} {
    %c0 = arith.constant 0 : index
    %c0_0 = arith.constant 0 : index
    %0 = vector.load %arg1[%c0, %c0_0] : memref<400x9xbf16, #tpu.memory_space<vmem>>, vector<400x9xbf16>
    %c0_1 = arith.constant 0 : index
    %c0_2 = arith.constant 0 : index
    %1 = vector.load %arg2[%c0_1, %c0_2] : memref<9x128xbf16, #tpu.memory_space<vmem>>, vector<9x128xbf16>
    %cst = arith.constant dense<0.000000e+00> : vector<400x128xf32>
    %2 = tpu.matmul %0, %1, %cst {dimension_numbers = #tpu.dot_dimension_numbers<[1], [0], [0], [1], [0, 0, 1, 1], [], []>} : vector<400x9xbf16>, vector<9x128xbf16>, vector<400x128xf32> -> vector<400x128xf32>
    %c0_3 = arith.constant 0 : index
    %c0_4 = arith.constant 0 : index
    %3 = vector.load %arg3[%c0_3, %c0_4] : memref<1x128xf32, #tpu.memory_space<vmem>>, vector<1x128xf32>
    %4 = vector.broadcast %3 : vector<1x128xf32> to vector<400x128xf32>
    %5 = arith.addf %2, %4 : vector<400x128xf32>
    %cst_5 = arith.constant 0.000000e+00 : f32
    %6 = vector.broadcast %cst_5 : f32 to vector<400x128xf32>
    %7 = arith.maximumf %5, %6 : vector<400x128xf32>
    %c0_6 = arith.constant 0 : index
    %c0_7 = arith.constant 0 : index
    %8 = vector.load %arg4[%c0_6, %c0_7] : memref<400x128xf32, #tpu.memory_space<vmem>>, vector<400x128xf32>
    tpu.vector_store %arg4[%c0_6, %c0_7], %7 {strides = array<i32>} : memref<400x128xf32, #tpu.memory_space<vmem>>, vector<400x128xf32>,
    return
  }
  func.func @transform_0(%arg0: i32) -> (i32, i32) {
    %c0_i32 = arith.constant 0 : i32
    %c0_i32_0 = arith.constant 0 : i32
    return %arg0, %c0_i32 : i32, i32
  }
  func.func @transform_1(%arg0: i32) -> (i32, i32) {
    %c0_i32 = arith.constant 0 : i32
    %c0_i32_0 = arith.constant 0 : i32
    %c0_i32_1 = arith.constant 0 : i32
    return %c0_i32, %c0_i32_0 : i32, i32
  }
  func.func @transform_2(%arg0: i32) -> (i32, i32) {
    %c0_i32 = arith.constant 0 : i32
    %c0_i32_0 = arith.constant 0 : i32
    %c0_i32_1 = arith.constant 0 : i32
    return %c0_i32, %c0_i32_0 : i32, i32
  }
  func.func @transform_3(%arg0: i32) -> (i32, i32) {
    %c0_i32 = arith.constant 0 : i32
    %c0_i32_0 = arith.constant 0 : i32
    return %arg0, %c0_i32 : i32, i32
  }
}

module attributes {stable_mosaic.version = 11 : i64} {
  func.func @_conv_bn_relu_fused_kernel(%arg0: i32, %arg1: memref<128x144xbf16, #tpu.memory_space<vmem>>, %arg2: memref<144x128xbf16, #tpu.memory_space<vmem>>, %arg3: memref<1x128xf32, #tpu.memory_space<vmem>>, %arg4: memref<1x128xf32, #tpu.memory_space<vmem>>, %arg5: memref<1x128xf32, #tpu.memory_space<vmem>>, %arg6: memref<128x128xf32, #tpu.memory_space<vmem>>) attributes {dimension_semantics = [#tpu.dimension_semantics<parallel>], iteration_bounds = array<i64: 1>, scalar_prefetch = 0 : i64, scratch_operands = 0 : i64, tpu.core_type = #tpu.core_type<tc>, window_params = [{transform_indices = @transform_0, window_bounds = array<i64: 128, 144>}, {pipeline_mode = #tpu.pipeline_mode<synchronous>, transform_indices = @transform_1, window_bounds = array<i64: 144, 128>}, {pipeline_mode = #tpu.pipeline_mode<synchronous>, transform_indices = @transform_2, window_bounds = array<i64: 1, 128>}, {pipeline_mode = #tpu.pipeline_mode<synchronous>, transform_indices = @transform_3, window_bounds = array<i64: 1, 128>}, {pipeline_mode = #tpu.pipeline_mode<synchronous>, transform_indices = @transform_4, window_bounds = array<i64: 1, 128>}, {transform_indices = @transform_5, window_bounds = array<i64: 128, 128>}]} {
    %c0 = arith.constant 0 : index
    %c0_0 = arith.constant 0 : index
    %0 = vector.load %arg3[%c0, %c0_0] : memref<1x128xf32, #tpu.memory_space<vmem>>, vector<1x128xf32>
    %c0_1 = arith.constant 0 : index
    %c0_2 = arith.constant 0 : index
    %1 = vector.load %arg1[%c0_1, %c0_2] : memref<128x144xbf16, #tpu.memory_space<vmem>>, vector<128x144xbf16>
    %c0_3 = arith.constant 0 : index
    %c0_4 = arith.constant 0 : index
    %2 = vector.load %arg2[%c0_3, %c0_4] : memref<144x128xbf16, #tpu.memory_space<vmem>>, vector<144x128xbf16>
    %cst = arith.constant dense<0.000000e+00> : vector<128x128xf32>
    %3 = tpu.matmul %1, %2, %cst {dimension_numbers = #tpu.dot_dimension_numbers<[1], [0], [0], [1], [0, 0, 1, 1], [], []>} : vector<128x144xbf16>, vector<144x128xbf16>, vector<128x128xf32> -> vector<128x128xf32>
    %4 = vector.broadcast %0 : vector<1x128xf32> to vector<128x128xf32>
    %5 = arith.addf %3, %4 : vector<128x128xf32>
    %cst_5 = arith.constant dense<0.000000e+00> : vector<128xf32>
    %6 = vector.multi_reduction <add>, %5, %cst_5 [0] : vector<128x128xf32> to vector<128xf32>
    %7 = vector.shape_cast %6 : vector<128xf32> to vector<1x128xf32>
    %cst_6 = arith.constant 0.000000e+00 : f32
    %8 = vector.broadcast %cst_6 : f32 to vector<1x128xf32>
    %9 = arith.mulf %8, %0 : vector<1x128xf32>
    %10 = arith.subf %7, %9 : vector<1x128xf32>
    %11 = arith.mulf %5, %5 : vector<128x128xf32>
    %cst_7 = arith.constant dense<0.000000e+00> : vector<128xf32>
    %12 = vector.multi_reduction <add>, %11, %cst_7 [0] : vector<128x128xf32> to vector<128xf32>
    %13 = vector.shape_cast %12 : vector<128xf32> to vector<1x128xf32>
    %14 = arith.mulf %0, %0 : vector<1x128xf32>
    %cst_8 = arith.constant 0.000000e+00 : f32
    %15 = vector.broadcast %cst_8 : f32 to vector<1x128xf32>
    %16 = arith.mulf %15, %14 : vector<1x128xf32>
    %17 = arith.subf %13, %16 : vector<1x128xf32>
    %cst_9 = arith.constant 7.812500e-03 : f32
    %18 = vector.broadcast %cst_9 : f32 to vector<1x128xf32>
    %19 = arith.mulf %10, %18 : vector<1x128xf32>
    %cst_10 = arith.constant 7.812500e-03 : f32
    %20 = vector.broadcast %cst_10 : f32 to vector<1x128xf32>
    %21 = arith.mulf %17, %20 : vector<1x128xf32>
    %22 = arith.mulf %19, %19 : vector<1x128xf32>
    %23 = arith.subf %21, %22 : vector<1x128xf32>
    %cst_11 = arith.constant 0.000000e+00 : f32
    %24 = vector.broadcast %cst_11 : f32 to vector<1x128xf32>
    %25 = arith.maximumf %23, %24 : vector<1x128xf32>
    %cst_12 = arith.constant 9.99999974E-6 : f32
    %26 = vector.broadcast %cst_12 : f32 to vector<1x128xf32>
    %27 = arith.addf %25, %26 : vector<1x128xf32>
    %28 = math.rsqrt %27 : vector<1x128xf32>
    %c0_13 = arith.constant 0 : index
    %c0_14 = arith.constant 0 : index
    %29 = vector.load %arg4[%c0_13, %c0_14] : memref<1x128xf32, #tpu.memory_space<vmem>>, vector<1x128xf32>
    %30 = arith.mulf %28, %29 : vector<1x128xf32>
    %c0_15 = arith.constant 0 : index
    %c0_16 = arith.constant 0 : index
    %31 = vector.load %arg5[%c0_15, %c0_16] : memref<1x128xf32, #tpu.memory_space<vmem>>, vector<1x128xf32>
    %32 = arith.mulf %19, %30 : vector<1x128xf32>
    %33 = arith.subf %31, %32 : vector<1x128xf32>
    %34 = vector.broadcast %30 : vector<1x128xf32> to vector<128x128xf32>
    %35 = arith.mulf %5, %34 : vector<128x128xf32>
    %36 = vector.broadcast %33 : vector<1x128xf32> to vector<128x128xf32>
    %37 = arith.addf %35, %36 : vector<128x128xf32>
    %cst_17 = arith.constant 0.000000e+00 : f32
    %38 = vector.broadcast %cst_17 : f32 to vector<128x128xf32>
    %39 = arith.maximumf %37, %38 : vector<128x128xf32>
    %c0_18 = arith.constant 0 : index
    %c0_19 = arith.constant 0 : index
    %40 = vector.load %arg6[%c0_18, %c0_19] : memref<128x128xf32, #tpu.memory_space<vmem>>, vector<128x128xf32>
    tpu.vector_store %arg6[%c0_18, %c0_19], %39 {strides = array<i32>} : memref<128x128xf32, #tpu.memory_space<vmem>>, vector<128x128xf32>,
    return
  }
  func.func @transform_0(%arg0: i32) -> (i32, i32) {
    %c0_i32 = arith.constant 0 : i32
    %c0_i32_0 = arith.constant 0 : i32
    return %arg0, %c0_i32 : i32, i32
  }
  func.func @transform_1(%arg0: i32) -> (i32, i32) {
    %c0_i32 = arith.constant 0 : i32
    %c0_i32_0 = arith.constant 0 : i32
    %c0_i32_1 = arith.constant 0 : i32
    return %c0_i32, %c0_i32_0 : i32, i32
  }
  func.func @transform_2(%arg0: i32) -> (i32, i32) {
    %c0_i32 = arith.constant 0 : i32
    %c0_i32_0 = arith.constant 0 : i32
    %c0_i32_1 = arith.constant 0 : i32
    return %c0_i32, %c0_i32_0 : i32, i32
  }
  func.func @transform_3(%arg0: i32) -> (i32, i32) {
    %c0_i32 = arith.constant 0 : i32
    %c0_i32_0 = arith.constant 0 : i32
    %c0_i32_1 = arith.constant 0 : i32
    return %c0_i32, %c0_i32_0 : i32, i32
  }
  func.func @transform_4(%arg0: i32) -> (i32, i32) {
    %c0_i32 = arith.constant 0 : i32
    %c0_i32_0 = arith.constant 0 : i32
    %c0_i32_1 = arith.constant 0 : i32
    return %c0_i32, %c0_i32_0 : i32, i32
  }
  func.func @transform_5(%arg0: i32) -> (i32, i32) {
    %c0_i32 = arith.constant 0 : i32
    %c0_i32_0 = arith.constant 0 : i32
    return %arg0, %c0_i32 : i32, i32
  }
}

module attributes {stable_mosaic.version = 11 : i64} {
  func.func @_conv_relu_kernel(%arg0: i32, %arg1: memref<32x800xbf16, #tpu.memory_space<vmem>>, %arg2: memref<800x128xbf16, #tpu.memory_space<vmem>>, %arg3: memref<1x128xf32, #tpu.memory_space<vmem>>, %arg4: memref<32x128xf32, #tpu.memory_space<vmem>>) attributes {dimension_semantics = [#tpu.dimension_semantics<parallel>], iteration_bounds = array<i64: 1>, scalar_prefetch = 0 : i64, scratch_operands = 0 : i64, tpu.core_type = #tpu.core_type<tc>, window_params = [{transform_indices = @transform_0, window_bounds = array<i64: 32, 800>}, {pipeline_mode = #tpu.pipeline_mode<synchronous>, transform_indices = @transform_1, window_bounds = array<i64: 800, 128>}, {pipeline_mode = #tpu.pipeline_mode<synchronous>, transform_indices = @transform_2, window_bounds = array<i64: 1, 128>}, {transform_indices = @transform_3, window_bounds = array<i64: 32, 128>}]} {
    %c0 = arith.constant 0 : index
    %c0_0 = arith.constant 0 : index
    %0 = vector.load %arg1[%c0, %c0_0] : memref<32x800xbf16, #tpu.memory_space<vmem>>, vector<32x800xbf16>
    %c0_1 = arith.constant 0 : index
    %c0_2 = arith.constant 0 : index
    %1 = vector.load %arg2[%c0_1, %c0_2] : memref<800x128xbf16, #tpu.memory_space<vmem>>, vector<800x128xbf16>
    %cst = arith.constant dense<0.000000e+00> : vector<32x128xf32>
    %2 = tpu.matmul %0, %1, %cst {dimension_numbers = #tpu.dot_dimension_numbers<[1], [0], [0], [1], [0, 0, 1, 1], [], []>} : vector<32x800xbf16>, vector<800x128xbf16>, vector<32x128xf32> -> vector<32x128xf32>
    %c0_3 = arith.constant 0 : index
    %c0_4 = arith.constant 0 : index
    %3 = vector.load %arg3[%c0_3, %c0_4] : memref<1x128xf32, #tpu.memory_space<vmem>>, vector<1x128xf32>
    %4 = vector.broadcast %3 : vector<1x128xf32> to vector<32x128xf32>
    %5 = arith.addf %2, %4 : vector<32x128xf32>
    %cst_5 = arith.constant 0.000000e+00 : f32
    %6 = vector.broadcast %cst_5 : f32 to vector<32x128xf32>
    %7 = arith.maximumf %5, %6 : vector<32x128xf32>
    %c0_6 = arith.constant 0 : index
    %c0_7 = arith.constant 0 : index
    %8 = vector.load %arg4[%c0_6, %c0_7] : memref<32x128xf32, #tpu.memory_space<vmem>>, vector<32x128xf32>
    tpu.vector_store %arg4[%c0_6, %c0_7], %7 {strides = array<i32>} : memref<32x128xf32, #tpu.memory_space<vmem>>, vector<32x128xf32>,
    return
  }
  func.func @transform_0(%arg0: i32) -> (i32, i32) {
    %c0_i32 = arith.constant 0 : i32
    %c0_i32_0 = arith.constant 0 : i32
    return %arg0, %c0_i32 : i32, i32
  }
  func.func @transform_1(%arg0: i32) -> (i32, i32) {
    %c0_i32 = arith.constant 0 : i32
    %c0_i32_0 = arith.constant 0 : i32
    %c0_i32_1 = arith.constant 0 : i32
    return %c0_i32, %c0_i32_0 : i32, i32
  }
  func.func @transform_2(%arg0: i32) -> (i32, i32) {
    %c0_i32 = arith.constant 0 : i32
    %c0_i32_0 = arith.constant 0 : i32
    %c0_i32_1 = arith.constant 0 : i32
    return %c0_i32, %c0_i32_0 : i32, i32
  }
  func.func @transform_3(%arg0: i32) -> (i32, i32) {
    %c0_i32 = arith.constant 0 : i32
    %c0_i32_0 = arith.constant 0 : i32
    return %arg0, %c0_i32 : i32, i32
  }
}

module attributes {stable_mosaic.version = 11 : i64} {
  func.func @_conv_bn_relu_fused_kernel(%arg0: i32, %arg1: memref<16x1600xbf16, #tpu.memory_space<vmem>>, %arg2: memref<1600x128xbf16, #tpu.memory_space<vmem>>, %arg3: memref<1x128xf32, #tpu.memory_space<vmem>>, %arg4: memref<1x128xf32, #tpu.memory_space<vmem>>, %arg5: memref<1x128xf32, #tpu.memory_space<vmem>>, %arg6: memref<16x128xf32, #tpu.memory_space<vmem>>) attributes {dimension_semantics = [#tpu.dimension_semantics<parallel>], iteration_bounds = array<i64: 1>, scalar_prefetch = 0 : i64, scratch_operands = 0 : i64, tpu.core_type = #tpu.core_type<tc>, window_params = [{transform_indices = @transform_0, window_bounds = array<i64: 16, 1600>}, {pipeline_mode = #tpu.pipeline_mode<synchronous>, transform_indices = @transform_1, window_bounds = array<i64: 1600, 128>}, {pipeline_mode = #tpu.pipeline_mode<synchronous>, transform_indices = @transform_2, window_bounds = array<i64: 1, 128>}, {pipeline_mode = #tpu.pipeline_mode<synchronous>, transform_indices = @transform_3, window_bounds = array<i64: 1, 128>}, {pipeline_mode = #tpu.pipeline_mode<synchronous>, transform_indices = @transform_4, window_bounds = array<i64: 1, 128>}, {transform_indices = @transform_5, window_bounds = array<i64: 16, 128>}]} {
    %c0 = arith.constant 0 : index
    %c0_0 = arith.constant 0 : index
    %0 = vector.load %arg3[%c0, %c0_0] : memref<1x128xf32, #tpu.memory_space<vmem>>, vector<1x128xf32>
    %c0_1 = arith.constant 0 : index
    %c0_2 = arith.constant 0 : index
    %1 = vector.load %arg1[%c0_1, %c0_2] : memref<16x1600xbf16, #tpu.memory_space<vmem>>, vector<16x1600xbf16>
    %c0_3 = arith.constant 0 : index
    %c0_4 = arith.constant 0 : index
    %2 = vector.load %arg2[%c0_3, %c0_4] : memref<1600x128xbf16, #tpu.memory_space<vmem>>, vector<1600x128xbf16>
    %cst = arith.constant dense<0.000000e+00> : vector<16x128xf32>
    %3 = tpu.matmul %1, %2, %cst {dimension_numbers = #tpu.dot_dimension_numbers<[1], [0], [0], [1], [0, 0, 1, 1], [], []>} : vector<16x1600xbf16>, vector<1600x128xbf16>, vector<16x128xf32> -> vector<16x128xf32>
    %4 = vector.broadcast %0 : vector<1x128xf32> to vector<16x128xf32>
    %5 = arith.addf %3, %4 : vector<16x128xf32>
    %cst_5 = arith.constant dense<0.000000e+00> : vector<128xf32>
    %6 = vector.multi_reduction <add>, %5, %cst_5 [0] : vector<16x128xf32> to vector<128xf32>
    %7 = vector.shape_cast %6 : vector<128xf32> to vector<1x128xf32>
    %cst_6 = arith.constant 8.000000e+00 : f32
    %8 = vector.broadcast %cst_6 : f32 to vector<1x128xf32>
    %9 = arith.mulf %8, %0 : vector<1x128xf32>
    %10 = arith.subf %7, %9 : vector<1x128xf32>
    %11 = arith.mulf %5, %5 : vector<16x128xf32>
    %cst_7 = arith.constant dense<0.000000e+00> : vector<128xf32>
    %12 = vector.multi_reduction <add>, %11, %cst_7 [0] : vector<16x128xf32> to vector<128xf32>
    %13 = vector.shape_cast %12 : vector<128xf32> to vector<1x128xf32>
    %14 = arith.mulf %0, %0 : vector<1x128xf32>
    %cst_8 = arith.constant 8.000000e+00 : f32
    %15 = vector.broadcast %cst_8 : f32 to vector<1x128xf32>
    %16 = arith.mulf %15, %14 : vector<1x128xf32>
    %17 = arith.subf %13, %16 : vector<1x128xf32>
    %cst_9 = arith.constant 1.250000e-01 : f32
    %18 = vector.broadcast %cst_9 : f32 to vector<1x128xf32>
    %19 = arith.mulf %10, %18 : vector<1x128xf32>
    %cst_10 = arith.constant 1.250000e-01 : f32
    %20 = vector.broadcast %cst_10 : f32 to vector<1x128xf32>
    %21 = arith.mulf %17, %20 : vector<1x128xf32>
    %22 = arith.mulf %19, %19 : vector<1x128xf32>
    %23 = arith.subf %21, %22 : vector<1x128xf32>
    %cst_11 = arith.constant 0.000000e+00 : f32
    %24 = vector.broadcast %cst_11 : f32 to vector<1x128xf32>
    %25 = arith.maximumf %23, %24 : vector<1x128xf32>
    %cst_12 = arith.constant 9.99999974E-6 : f32
    %26 = vector.broadcast %cst_12 : f32 to vector<1x128xf32>
    %27 = arith.addf %25, %26 : vector<1x128xf32>
    %28 = math.rsqrt %27 : vector<1x128xf32>
    %c0_13 = arith.constant 0 : index
    %c0_14 = arith.constant 0 : index
    %29 = vector.load %arg4[%c0_13, %c0_14] : memref<1x128xf32, #tpu.memory_space<vmem>>, vector<1x128xf32>
    %30 = arith.mulf %28, %29 : vector<1x128xf32>
    %c0_15 = arith.constant 0 : index
    %c0_16 = arith.constant 0 : index
    %31 = vector.load %arg5[%c0_15, %c0_16] : memref<1x128xf32, #tpu.memory_space<vmem>>, vector<1x128xf32>
    %32 = arith.mulf %19, %30 : vector<1x128xf32>
    %33 = arith.subf %31, %32 : vector<1x128xf32>
    %34 = vector.broadcast %30 : vector<1x128xf32> to vector<16x128xf32>
    %35 = arith.mulf %5, %34 : vector<16x128xf32>
    %36 = vector.broadcast %33 : vector<1x128xf32> to vector<16x128xf32>
    %37 = arith.addf %35, %36 : vector<16x128xf32>
    %cst_17 = arith.constant 0.000000e+00 : f32
    %38 = vector.broadcast %cst_17 : f32 to vector<16x128xf32>
    %39 = arith.maximumf %37, %38 : vector<16x128xf32>
    %c0_18 = arith.constant 0 : index
    %c0_19 = arith.constant 0 : index
    %40 = vector.load %arg6[%c0_18, %c0_19] : memref<16x128xf32, #tpu.memory_space<vmem>>, vector<16x128xf32>
    tpu.vector_store %arg6[%c0_18, %c0_19], %39 {strides = array<i32>} : memref<16x128xf32, #tpu.memory_space<vmem>>, vector<16x128xf32>,
    return
  }
  func.func @transform_0(%arg0: i32) -> (i32, i32) {
    %c0_i32 = arith.constant 0 : i32
    %c0_i32_0 = arith.constant 0 : i32
    return %arg0, %c0_i32 : i32, i32
  }
  func.func @transform_1(%arg0: i32) -> (i32, i32) {
    %c0_i32 = arith.constant 0 : i32
    %c0_i32_0 = arith.constant 0 : i32
    %c0_i32_1 = arith.constant 0 : i32
    return %c0_i32, %c0_i32_0 : i32, i32
  }
  func.func @transform_2(%arg0: i32) -> (i32, i32) {
    %c0_i32 = arith.constant 0 : i32
    %c0_i32_0 = arith.constant 0 : i32
    %c0_i32_1 = arith.constant 0 : i32
    return %c0_i32, %c0_i32_0 : i32, i32
  }
  func.func @transform_3(%arg0: i32) -> (i32, i32) {
    %c0_i32 = arith.constant 0 : i32
    %c0_i32_0 = arith.constant 0 : i32
    %c0_i32_1 = arith.constant 0 : i32
    return %c0_i32, %c0_i32_0 : i32, i32
  }
  func.func @transform_4(%arg0: i32) -> (i32, i32) {
    %c0_i32 = arith.constant 0 : i32
    %c0_i32_0 = arith.constant 0 : i32
    %c0_i32_1 = arith.constant 0 : i32
    return %c0_i32, %c0_i32_0 : i32, i32
  }
  func.func @transform_5(%arg0: i32) -> (i32, i32) {
    %c0_i32 = arith.constant 0 : i32
    %c0_i32_0 = arith.constant 0 : i32
    return %arg0, %c0_i32 : i32, i32
  }
}

module attributes {stable_mosaic.version = 11 : i64} {
  func.func @_cfc_rnn_kernel(%arg0: memref<64x32xbf16, #tpu.memory_space<vmem>>, %arg1: memref<32x128xbf16, #tpu.memory_space<vmem>>, %arg2: memref<1x128xf32, #tpu.memory_space<vmem>>, %arg3: memref<32x128xbf16, #tpu.memory_space<vmem>>, %arg4: memref<16x32xf32, #tpu.memory_space<vmem>>) attributes {dimension_semantics = [], scalar_prefetch = 0 : i64, scratch_operands = 0 : i64, tpu.core_type = #tpu.core_type<tc>} {
    %c0 = arith.constant 0 : index
    %c0_0 = arith.constant 0 : index
    %0 = vector.load %arg0[%c0, %c0_0] : memref<64x32xbf16, #tpu.memory_space<vmem>>, vector<64x32xbf16>
    %c0_1 = arith.constant 0 : index
    %c0_2 = arith.constant 0 : index
    %1 = vector.load %arg1[%c0_1, %c0_2] : memref<32x128xbf16, #tpu.memory_space<vmem>>, vector<32x128xbf16>
    %cst = arith.constant dense<0.000000e+00> : vector<64x128xf32>
    %2 = tpu.matmul %0, %1, %cst {dimension_numbers = #tpu.dot_dimension_numbers<[1], [0], [0], [1], [0, 0, 1, 1], [], []>} : vector<64x32xbf16>, vector<32x128xbf16>, vector<64x128xf32> -> vector<64x128xf32>
    %c0_3 = arith.constant 0 : index
    %c0_4 = arith.constant 0 : index
    %3 = vector.load %arg2[%c0_3, %c0_4] : memref<1x128xf32, #tpu.memory_space<vmem>>, vector<1x128xf32>
    %4 = vector.broadcast %3 : vector<1x128xf32> to vector<64x128xf32>
    %5 = arith.addf %2, %4 : vector<64x128xf32>
    %cst_5 = arith.constant 0.000000e+00 : f32
    %6 = vector.broadcast %cst_5 : f32 to vector<16x32xf32>
    %7 = vector.extract_strided_slice %5 {offsets = [0, 0], sizes = [16, 128], strides = [1, 1]} : vector<64x128xf32> to vector<16x128xf32>
    %8 = arith.truncf %6 : vector<16x32xf32> to vector<16x32xbf16>
    %c0_6 = arith.constant 0 : index
    %c0_7 = arith.constant 0 : index
    %9 = vector.load %arg3[%c0_6, %c0_7] : memref<32x128xbf16, #tpu.memory_space<vmem>>, vector<32x128xbf16>
    %cst_8 = arith.constant dense<0.000000e+00> : vector<16x128xf32>
    %10 = tpu.matmul %8, %9, %cst_8 {dimension_numbers = #tpu.dot_dimension_numbers<[1], [0], [0], [1], [0, 0, 1, 1], [], []>} : vector<16x32xbf16>, vector<32x128xbf16>, vector<16x128xf32> -> vector<16x128xf32>
    %11 = arith.addf %7, %10 : vector<16x128xf32>
    %12 = vector.extract_strided_slice %11 {offsets = [0, 0], sizes = [16, 32], strides = [1, 1]} : vector<16x128xf32> to vector<16x32xf32>
    %13 = math.tanh %12 : vector<16x32xf32>
    %14 = vector.extract_strided_slice %11 {offsets = [0, 32], sizes = [16, 32], strides = [1, 1]} : vector<16x128xf32> to vector<16x32xf32>
    %15 = math.tanh %14 : vector<16x32xf32>
    %16 = vector.extract_strided_slice %11 {offsets = [0, 64], sizes = [16, 32], strides = [1, 1]} : vector<16x128xf32> to vector<16x32xf32>
    %17 = arith.negf %16 : vector<16x32xf32>
    %18 = math.exp %17 : vector<16x32xf32>
    %cst_9 = arith.constant 1.000000e+00 : f32
    %19 = vector.broadcast %cst_9 : f32 to vector<16x32xf32>
    %20 = arith.addf %19, %18 : vector<16x32xf32>
    %21 = arith.divf %19, %20 : vector<16x32xf32>
    %cst_10 = arith.constant 1.000000e+00 : f32
    %22 = vector.broadcast %cst_10 : f32 to vector<16x32xf32>
    %23 = arith.subf %22, %21 : vector<16x32xf32>
    %24 = arith.mulf %13, %23 : vector<16x32xf32>
    %25 = arith.mulf %21, %15 : vector<16x32xf32>
    %26 = arith.addf %24, %25 : vector<16x32xf32>
    %27 = vector.extract_strided_slice %5 {offsets = [16, 0], sizes = [16, 128], strides = [1, 1]} : vector<64x128xf32> to vector<16x128xf32>
    %28 = arith.truncf %26 : vector<16x32xf32> to vector<16x32xbf16>
    %c0_11 = arith.constant 0 : index
    %c0_12 = arith.constant 0 : index
    %29 = vector.load %arg3[%c0_11, %c0_12] : memref<32x128xbf16, #tpu.memory_space<vmem>>, vector<32x128xbf16>
    %cst_13 = arith.constant dense<0.000000e+00> : vector<16x128xf32>
    %30 = tpu.matmul %28, %29, %cst_13 {dimension_numbers = #tpu.dot_dimension_numbers<[1], [0], [0], [1], [0, 0, 1, 1], [], []>} : vector<16x32xbf16>, vector<32x128xbf16>, vector<16x128xf32> -> vector<16x128xf32>
    %31 = arith.addf %27, %30 : vector<16x128xf32>
    %32 = vector.extract_strided_slice %31 {offsets = [0, 0], sizes = [16, 32], strides = [1, 1]} : vector<16x128xf32> to vector<16x32xf32>
    %33 = math.tanh %32 : vector<16x32xf32>
    %34 = vector.extract_strided_slice %31 {offsets = [0, 32], sizes = [16, 32], strides = [1, 1]} : vector<16x128xf32> to vector<16x32xf32>
    %35 = math.tanh %34 : vector<16x32xf32>
    %36 = vector.extract_strided_slice %31 {offsets = [0, 64], sizes = [16, 32], strides = [1, 1]} : vector<16x128xf32> to vector<16x32xf32>
    %37 = arith.negf %36 : vector<16x32xf32>
    %38 = math.exp %37 : vector<16x32xf32>
    %cst_14 = arith.constant 1.000000e+00 : f32
    %39 = vector.broadcast %cst_14 : f32 to vector<16x32xf32>
    %40 = arith.addf %39, %38 : vector<16x32xf32>
    %41 = arith.divf %39, %40 : vector<16x32xf32>
    %cst_15 = arith.constant 1.000000e+00 : f32
    %42 = vector.broadcast %cst_15 : f32 to vector<16x32xf32>
    %43 = arith.subf %42, %41 : vector<16x32xf32>
    %44 = arith.mulf %33, %43 : vector<16x32xf32>
    %45 = arith.mulf %41, %35 : vector<16x32xf32>
    %46 = arith.addf %44, %45 : vector<16x32xf32>
    %47 = vector.extract_strided_slice %5 {offsets = [32, 0], sizes = [16, 128], strides = [1, 1]} : vector<64x128xf32> to vector<16x128xf32>
    %48 = arith.truncf %46 : vector<16x32xf32> to vector<16x32xbf16>
    %c0_16 = arith.constant 0 : index
    %c0_17 = arith.constant 0 : index
    %49 = vector.load %arg3[%c0_16, %c0_17] : memref<32x128xbf16, #tpu.memory_space<vmem>>, vector<32x128xbf16>
    %cst_18 = arith.constant dense<0.000000e+00> : vector<16x128xf32>
    %50 = tpu.matmul %48, %49, %cst_18 {dimension_numbers = #tpu.dot_dimension_numbers<[1], [0], [0], [1], [0, 0, 1, 1], [], []>} : vector<16x32xbf16>, vector<32x128xbf16>, vector<16x128xf32> -> vector<16x128xf32>
    %51 = arith.addf %47, %50 : vector<16x128xf32>
    %52 = vector.extract_strided_slice %51 {offsets = [0, 0], sizes = [16, 32], strides = [1, 1]} : vector<16x128xf32> to vector<16x32xf32>
    %53 = math.tanh %52 : vector<16x32xf32>
    %54 = vector.extract_strided_slice %51 {offsets = [0, 32], sizes = [16, 32], strides = [1, 1]} : vector<16x128xf32> to vector<16x32xf32>
    %55 = math.tanh %54 : vector<16x32xf32>
    %56 = vector.extract_strided_slice %51 {offsets = [0, 64], sizes = [16, 32], strides = [1, 1]} : vector<16x128xf32> to vector<16x32xf32>
    %57 = arith.negf %56 : vector<16x32xf32>
    %58 = math.exp %57 : vector<16x32xf32>
    %cst_19 = arith.constant 1.000000e+00 : f32
    %59 = vector.broadcast %cst_19 : f32 to vector<16x32xf32>
    %60 = arith.addf %59, %58 : vector<16x32xf32>
    %61 = arith.divf %59, %60 : vector<16x32xf32>
    %cst_20 = arith.constant 1.000000e+00 : f32
    %62 = vector.broadcast %cst_20 : f32 to vector<16x32xf32>
    %63 = arith.subf %62, %61 : vector<16x32xf32>
    %64 = arith.mulf %53, %63 : vector<16x32xf32>
    %65 = arith.mulf %61, %55 : vector<16x32xf32>
    %66 = arith.addf %64, %65 : vector<16x32xf32>
    %67 = vector.extract_strided_slice %5 {offsets = [48, 0], sizes = [16, 128], strides = [1, 1]} : vector<64x128xf32> to vector<16x128xf32>
    %68 = arith.truncf %66 : vector<16x32xf32> to vector<16x32xbf16>
    %c0_21 = arith.constant 0 : index
    %c0_22 = arith.constant 0 : index
    %69 = vector.load %arg3[%c0_21, %c0_22] : memref<32x128xbf16, #tpu.memory_space<vmem>>, vector<32x128xbf16>
    %cst_23 = arith.constant dense<0.000000e+00> : vector<16x128xf32>
    %70 = tpu.matmul %68, %69, %cst_23 {dimension_numbers = #tpu.dot_dimension_numbers<[1], [0], [0], [1], [0, 0, 1, 1], [], []>} : vector<16x32xbf16>, vector<32x128xbf16>, vector<16x128xf32> -> vector<16x128xf32>
    %71 = arith.addf %67, %70 : vector<16x128xf32>
    %72 = vector.extract_strided_slice %71 {offsets = [0, 0], sizes = [16, 32], strides = [1, 1]} : vector<16x128xf32> to vector<16x32xf32>
    %73 = math.tanh %72 : vector<16x32xf32>
    %74 = vector.extract_strided_slice %71 {offsets = [0, 32], sizes = [16, 32], strides = [1, 1]} : vector<16x128xf32> to vector<16x32xf32>
    %75 = math.tanh %74 : vector<16x32xf32>
    %76 = vector.extract_strided_slice %71 {offsets = [0, 64], sizes = [16, 32], strides = [1, 1]} : vector<16x128xf32> to vector<16x32xf32>
    %77 = arith.negf %76 : vector<16x32xf32>
    %78 = math.exp %77 : vector<16x32xf32>
    %cst_24 = arith.constant 1.000000e+00 : f32
    %79 = vector.broadcast %cst_24 : f32 to vector<16x32xf32>
    %80 = arith.addf %79, %78 : vector<16x32xf32>
    %81 = arith.divf %79, %80 : vector<16x32xf32>
    %cst_25 = arith.constant 1.000000e+00 : f32
    %82 = vector.broadcast %cst_25 : f32 to vector<16x32xf32>
    %83 = arith.subf %82, %81 : vector<16x32xf32>
    %84 = arith.mulf %73, %83 : vector<16x32xf32>
    %85 = arith.mulf %81, %75 : vector<16x32xf32>
    %86 = arith.addf %84, %85 : vector<16x32xf32>
    %c0_26 = arith.constant 0 : index
    %c0_27 = arith.constant 0 : index
    %87 = vector.load %arg4[%c0_26, %c0_27] : memref<16x32xf32, #tpu.memory_space<vmem>>, vector<16x32xf32>
    tpu.vector_store %arg4[%c0_26, %c0_27], %86 {strides = array<i32>} : memref<16x32xf32, #tpu.memory_space<vmem>>, vector<16x32xf32>,
    return
  }
}

</mosaic_0001>

<bundles_post_ra>
// kernel: lnn_forward.5
= control target key start
LH: loop header
LB: loop body
LE: loop exit
PB: predicated region body
PF: predicated region fallthrough
CT: control target
= control target key end

     0   :  { %vm280_vm0 = vcmask 1043456   ;;  %vm281_vm1 = vcmask 1044480   ;;  %v835_v0 = vmov 0.0   ;;  %v836_v2 = vmov 65535   ;;  %s1218_s1 = inlined_call_operand.vmem [shape: bf16[9,128], index: 1, kind: input, shape index: {}]   ;;  %s1219_s0 = inlined_call_operand.vmem [shape: bf16[400,9], index: 0, kind: input, shape index: {}]   ;;  %s1220_s2 = inlined_call_operand.vmem [shape: f32[1,128], index: 2, kind: input, shape index: {}]   ;;  %s1221_s3 = inlined_call_operand.vmem [shape: f32[400,128], index: 3, kind: output, shape index: {}]  }
   0x1   :  { %702 = vmatprep.subr.bf16.mxu0 %v835_v0  ;;  %v809_v1 = vld [vmem:[%s1218_s1] sm:$0x1f]   ;;  %804 = vmatprep.subr.bf16.mxu1 %v835_v0  ;;  %v282_v3 = vsel %vm280_vm0, 4294967295, %v836_v2  ;;  %vm837_vm2 = vmmov 0   ;;  %v811_v7 = vld [vmem:[%s1219_s0 + $0x68] sm:$0xff]   ;;  %vm204_vm3 = vcmask 72704  }
   0x2   :  { %v283_v4 = vsel %vm281_vm1, %v282_v3, 0  ;;  %704 = vmatprep.mubr.msk.bf16.mxu0 %vm837_vm2, %v835_v0  ;;  %v810_v5 = vld [vmem:[%s1219_s0] sm:$0xff]   ;;  %756 = vmatprep.mubr.msk.bf16.mxu1 %vm837_vm2, %v835_v0  ;;  %v812_v8 = vld [vmem:[%s1219_s0 + $0x8] sm:$0xff]   ;;  %v813_v9 = vld [vmem:[%s1219_s0 + $0x70] sm:$0xff]  }
   0x3   :  { %v285_v6 = vand.u32 %v809_v1, %v283_v4  ;;  %v814_v10 = vld [vmem:[%s1219_s0 + $0x10] sm:$0xff]   ;;  %v815_v11 = vld [vmem:[%s1219_s0 + $0x78] sm:$0xff]   ;;  %v817_v13 = vld [vmem:[%s1219_s0 + $0x80] sm:$0xff]  }
   0x4   :  { %v816_v12 = vld [vmem:[%s1219_s0 + $0x18] sm:$0xff]   ;;  %v818_v14 = vld [vmem:[%s1219_s0 + $0x20] sm:$0xff]   ;;  %v819_v15 = vld [vmem:[%s1219_s0 + $0x88] sm:$0xff]  }
   0x5   :  { %703 = vmatpush3.bf16.msra.mxu0 %v285_v6  ;;  %805 = vmatpush3.bf16.msra.mxu1 %v285_v6  ;;  %v820_v16 = vld [vmem:[%s1219_s0 + $0x28] sm:$0xff]   ;;  %v821_v17 = vld [vmem:[%s1219_s0 + $0x90] sm:$0xff]   ;;  %v823_v19 = vld [vmem:[%s1219_s0 + $0x98] sm:$0xff]  }
   0x6   :  { %v822_v18 = vld [vmem:[%s1219_s0 + $0x30] sm:$0xff]   ;;  %v824_v20 = vld [vmem:[%s1219_s0 + $0x38] sm:$0xff]   ;;  %v825_v21 = vld [vmem:[%s1219_s0 + $0xa0] sm:$0xff]  }
   0x7   :  { %v826_v22 = vld [vmem:[%s1219_s0 + $0x40] sm:$0xff]   ;;  %v827_v23 = vld [vmem:[%s1219_s0 + $0xa8] sm:$0xff]   ;;  %v829_v25 = vld [vmem:[%s1219_s0 + $0xb0] sm:$0xff]  }
   0x8   :  { %705 = vmatmul.mubr.msk.bf16.vlgmr.msra.gmra.mrb[0].mxu0 %vm204_vm3, %v810_v5  ;;  %757 = vmatmul.mubr.msk.bf16.vlgmr.msra.gmra.mrb[0].mxu1 %vm204_vm3, %v811_v7  ;;  %v828_v24 = vld [vmem:[%s1219_s0 + $0x48] sm:$0xff]   ;;  %v830_v26 = vld [vmem:[%s1219_s0 + $0x50] sm:$0xff]   ;;  %v831_v27 = vld [vmem:[%s1219_s0 + $0xb8] sm:$0xff]  }
   0x9   :  { %708 = vmatprep.mubr.msk.bf16.mxu0 %vm837_vm2, %v835_v0  ;;  %760 = vmatprep.mubr.msk.bf16.mxu1 %vm837_vm2, %v835_v0  ;;  %v832_v28 = vld [vmem:[%s1219_s0 + $0x58] sm:$0xff]   ;;  %v833_v29 = vld [vmem:[%s1219_s0 + $0xc0] sm:$0xff]  }
   0xa   :  { %v834_v30 = vld [vmem:[%s1219_s0 + $0x60] sm:$0xff]  }
   0xb   :  { %v1016_v31 = vld [vmem:[%s1220_s2] ss:$0 sm:$0xff] }
  0x10   :  { %709 = vmatmul.mubr.msk.bf16.gmra.mrb[4].mxu0 %vm204_vm3, %v812_v8  ;;  %761 = vmatmul.mubr.msk.bf16.gmra.mrb[4].mxu1 %vm204_vm3, %v813_v9 }
  0x11   :  { %712 = vmatprep.mubr.msk.bf16.mxu0 %vm837_vm2, %v835_v0  ;;  %764 = vmatprep.mubr.msk.bf16.mxu1 %vm837_vm2, %v835_v0 }
  0x18   :  { %713 = vmatmul.mubr.msk.bf16.gmra.mrb[8].mxu0 %vm204_vm3, %v814_v10  ;;  %765 = vmatmul.mubr.msk.bf16.gmra.mrb[8].mxu1 %vm204_vm3, %v815_v11 }
  0x19   :  { %716 = vmatprep.mubr.msk.bf16.mxu0 %vm837_vm2, %v835_v0  ;;  %768 = vmatprep.mubr.msk.bf16.mxu1 %vm837_vm2, %v835_v0 }
  0x20   :  { %717 = vmatmul.mubr.msk.bf16.gmra.mrb[12].mxu0 %vm204_vm3, %v816_v12  ;;  %769 = vmatmul.mubr.msk.bf16.gmra.mrb[12].mxu1 %vm204_vm3, %v817_v13 }
  0x21   :  { %720 = vmatprep.mubr.msk.bf16.mxu0 %vm837_vm2, %v835_v0  ;;  %772 = vmatprep.mubr.msk.bf16.mxu1 %vm837_vm2, %v835_v0 }
  0x28   :  { %721 = vmatmul.mubr.msk.bf16.gmra.mrb[16].mxu0 %vm204_vm3, %v818_v14  ;;  %773 = vmatmul.mubr.msk.bf16.gmra.mrb[16].mxu1 %vm204_vm3, %v819_v15 }
  0x29   :  { %724 = vmatprep.mubr.msk.bf16.mxu0 %vm837_vm2, %v835_v0  ;;  %776 = vmatprep.mubr.msk.bf16.mxu1 %vm837_vm2, %v835_v0 }
  0x30   :  { %725 = vmatmul.mubr.msk.bf16.gmra.mrb[20].mxu0 %vm204_vm3, %v820_v16  ;;  %777 = vmatmul.mubr.msk.bf16.gmra.mrb[20].mxu1 %vm204_vm3, %v821_v17 }
  0x31   :  { %728 = vmatprep.mubr.msk.bf16.mxu0 %vm837_vm2, %v835_v0  ;;  %780 = vmatprep.mubr.msk.bf16.mxu1 %vm837_vm2, %v835_v0 }
  0x38   :  { %729 = vmatmul.mubr.msk.bf16.gmra.mrb[24].mxu0 %vm204_vm3, %v822_v18  ;;  %781 = vmatmul.mubr.msk.bf16.gmra.mrb[24].mxu1 %vm204_vm3, %v823_v19 }
  0x39   :  { %732 = vmatprep.mubr.msk.bf16.mxu0 %vm837_vm2, %v835_v0  ;;  %784 = vmatprep.mubr.msk.bf16.mxu1 %vm837_vm2, %v835_v0 }
  0x40   :  { %733 = vmatmul.mubr.msk.bf16.gmra.mrb[28].mxu0 %vm204_vm3, %v824_v20  ;;  %785 = vmatmul.mubr.msk.bf16.gmra.mrb[28].mxu1 %vm204_vm3, %v825_v21 }
  0x41   :  { %736 = vmatprep.mubr.msk.bf16.mxu0 %vm837_vm2, %v835_v0  ;;  %788 = vmatprep.mubr.msk.bf16.mxu1 %vm837_vm2, %v835_v0 }
  0x48   :  { %737 = vmatmul.mubr.msk.bf16.gmra.mrb[32].mxu0 %vm204_vm3, %v826_v22  ;;  %789 = vmatmul.mubr.msk.bf16.gmra.mrb[32].mxu1 %vm204_vm3, %v827_v23 }
  0x49   :  { %740 = vmatprep.mubr.msk.bf16.mxu0 %vm837_vm2, %v835_v0  ;;  %792 = vmatprep.mubr.msk.bf16.mxu1 %vm837_vm2, %v835_v0 }
  0x50   :  { %741 = vmatmul.mubr.msk.bf16.gmra.mrb[36].mxu0 %vm204_vm3, %v828_v24  ;;  %793 = vmatmul.mubr.msk.bf16.gmra.mrb[36].mxu1 %vm204_vm3, %v829_v25 }
  0x51   :  { %744 = vmatprep.mubr.msk.bf16.mxu0 %vm837_vm2, %v835_v0  ;;  %796 = vmatprep.mubr.msk.bf16.mxu1 %vm837_vm2, %v835_v0 }
  0x58   :  { %745 = vmatmul.mubr.msk.bf16.gmra.mrb[40].mxu0 %vm204_vm3, %v830_v26  ;;  %797 = vmatmul.mubr.msk.bf16.gmra.mrb[40].mxu1 %vm204_vm3, %v831_v27 }
  0x59   :  { %748 = vmatprep.mubr.msk.bf16.mxu0 %vm837_vm2, %v835_v0  ;;  %800 = vmatprep.mubr.msk.bf16.mxu1 %vm837_vm2, %v835_v0 }
  0x60   :  { %749 = vmatmul.mubr.msk.bf16.gmra.mrb[44].mxu0 %vm204_vm3, %v832_v28  ;;  %801 = vmatmul.mubr.msk.bf16.gmra.mrb[44].mxu1 %vm204_vm3, %v833_v29 }
  0x61   :  { %752 = vmatprep.mubr.msk.bf16.mxu0 %vm837_vm2, %v835_v0 }
  0x68   :  { %753 = vmatmul.mubr.msk.bf16.gmra.mrb[48].mxu0 %vm204_vm3, %v834_v30 }
  0xdb   :  { %v321_v32 = vpop.f32.mrb[0].mxu0  ;;  %v425_v33 = vpop.f32.mrb[0].mxu1 }
  0xdc   :  { %v322_v34 = vadd.f32 %v1016_v31, %v321_v32  ;;  %v706_v35 = vpop.f32.mrb[1].mxu0  ;;  %v426_v36 = vadd.f32 %v1016_v31, %v425_v33  ;;  %v758_v37 = vpop.f32.mrb[1].mxu1 }
  0xdd   :  { %v324_v38 = vpop.f32.mrb[2].mxu0  ;;  %v428_v39 = vpop.f32.mrb[2].mxu1 }
  0xde   :  { %v520_v40 = vmax.f32 %v322_v34, 0.0  ;;  %v325_v41 = vadd.f32 %v1016_v31, %v324_v38  ;;  %v707_v42 = vpop.f32.mrb[3].mxu0  ;;  %v546_v43 = vmax.f32 %v426_v36, 0.0  ;;  %v429_v44 = vadd.f32 %v1016_v31, %v428_v39  ;;  %v759_v45 = vpop.f32.mrb[3].mxu1 }
  0xe0   :  { %570 = vst [vmem:[%s1221_s3] sm:$0xff] %v520_v40  ;;  %v521_v46 = vmax.f32 %v325_v41, 0.0  ;;  %596 = vst [vmem:[%s1221_s3 + $0xd0] sm:$0xff] %v546_v43  ;;  %v547_v47 = vmax.f32 %v429_v44, 0.0 }
  0xe2   :  { %571 = vst [vmem:[%s1221_s3 + $0x8] sm:$0xff] %v521_v46  ;;  %597 = vst [vmem:[%s1221_s3 + $0xd8] sm:$0xff] %v547_v47 }
  0xe3   :  { %v329_v48 = vpop.f32.mrb[4].mxu0  ;;  %v433_v49 = vpop.f32.mrb[4].mxu1 }
  0xe4   :  { %v330_v50 = vadd.f32 %v1016_v31, %v329_v48  ;;  %v710_v51 = vpop.f32.mrb[5].mxu0  ;;  %v434_v52 = vadd.f32 %v1016_v31, %v433_v49  ;;  %v762_v53 = vpop.f32.mrb[5].mxu1 }
  0xe5   :  { %v332_v54 = vpop.f32.mrb[6].mxu0  ;;  %v436_v55 = vpop.f32.mrb[6].mxu1 }
  0xe6   :  { %v522_v56 = vmax.f32 %v330_v50, 0.0  ;;  %v333_v57 = vadd.f32 %v1016_v31, %v332_v54  ;;  %v711_v58 = vpop.f32.mrb[7].mxu0  ;;  %v548_v59 = vmax.f32 %v434_v52, 0.0  ;;  %v437_v60 = vadd.f32 %v1016_v31, %v436_v55  ;;  %v763_v61 = vpop.f32.mrb[7].mxu1 }
  0xe8   :  { %572 = vst [vmem:[%s1221_s3 + $0x10] sm:$0xff] %v522_v56  ;;  %v523_v62 = vmax.f32 %v333_v57, 0.0  ;;  %598 = vst [vmem:[%s1221_s3 + $0xe0] sm:$0xff] %v548_v59  ;;  %v549_v63 = vmax.f32 %v437_v60, 0.0 }
  0xea   :  { %573 = vst [vmem:[%s1221_s3 + $0x18] sm:$0xff] %v523_v62  ;;  %599 = vst [vmem:[%s1221_s3 + $0xe8] sm:$0xff] %v549_v63 }
  0xeb   :  { %v337_v0 = vpop.f32.mrb[8].mxu0  ;;  %v441_v1 = vpop.f32.mrb[8].mxu1 }
  0xec   :  { %v338_v2 = vadd.f32 %v1016_v31, %v337_v0  ;;  %v714_v3 = vpop.f32.mrb[9].mxu0  ;;  %v442_v4 = vadd.f32 %v1016_v31, %v441_v1  ;;  %v766_v5 = vpop.f32.mrb[9].mxu1 }
  0xed   :  { %v340_v6 = vpop.f32.mrb[10].mxu0  ;;  %v444_v7 = vpop.f32.mrb[10].mxu1 }
  0xee   :  { %v524_v8 = vmax.f32 %v338_v2, 0.0  ;;  %v341_v9 = vadd.f32 %v1016_v31, %v340_v6  ;;  %v715_v10 = vpop.f32.mrb[11].mxu0  ;;  %v550_v11 = vmax.f32 %v442_v4, 0.0  ;;  %v445_v12 = vadd.f32 %v1016_v31, %v444_v7  ;;  %v767_v13 = vpop.f32.mrb[11].mxu1 }
  0xf0   :  { %574 = vst [vmem:[%s1221_s3 + $0x20] sm:$0xff] %v524_v8  ;;  %v525_v14 = vmax.f32 %v341_v9, 0.0  ;;  %600 = vst [vmem:[%s1221_s3 + $0xf0] sm:$0xff] %v550_v11  ;;  %v551_v15 = vmax.f32 %v445_v12, 0.0 }
  0xf2   :  { %575 = vst [vmem:[%s1221_s3 + $0x28] sm:$0xff] %v525_v14  ;;  %601 = vst [vmem:[%s1221_s3 + $0xf8] sm:$0xff] %v551_v15 }
  0xf3   :  { %v345_v16 = vpop.f32.mrb[12].mxu0  ;;  %v449_v17 = vpop.f32.mrb[12].mxu1 }
  0xf4   :  { %v346_v18 = vadd.f32 %v1016_v31, %v345_v16  ;;  %v718_v19 = vpop.f32.mrb[13].mxu0  ;;  %v450_v20 = vadd.f32 %v1016_v31, %v449_v17  ;;  %v770_v21 = vpop.f32.mrb[13].mxu1 }
  0xf5   :  { %v348_v22 = vpop.f32.mrb[14].mxu0  ;;  %v452_v23 = vpop.f32.mrb[14].mxu1 }
  0xf6   :  { %v526_v24 = vmax.f32 %v346_v18, 0.0  ;;  %v349_v25 = vadd.f32 %v1016_v31, %v348_v22  ;;  %v719_v26 = vpop.f32.mrb[15].mxu0  ;;  %v552_v27 = vmax.f32 %v450_v20, 0.0  ;;  %v453_v28 = vadd.f32 %v1016_v31, %v452_v23  ;;  %v771_v29 = vpop.f32.mrb[15].mxu1 }
  0xf8   :  { %576 = vst [vmem:[%s1221_s3 + $0x30] sm:$0xff] %v526_v24  ;;  %v527_v30 = vmax.f32 %v349_v25, 0.0  ;;  %602 = vst [vmem:[%s1221_s3 + $0x100] sm:$0xff] %v552_v27  ;;  %v553_v32 = vmax.f32 %v453_v28, 0.0 }
  0xfa   :  { %577 = vst [vmem:[%s1221_s3 + $0x38] sm:$0xff] %v527_v30  ;;  %603 = vst [vmem:[%s1221_s3 + $0x108] sm:$0xff] %v553_v32 }
  0xfb   :  { %v353_v33 = vpop.f32.mrb[16].mxu0  ;;  %v457_v34 = vpop.f32.mrb[16].mxu1 }
  0xfc   :  { %v354_v35 = vadd.f32 %v1016_v31, %v353_v33  ;;  %v722_v36 = vpop.f32.mrb[17].mxu0  ;;  %v458_v37 = vadd.f32 %v1016_v31, %v457_v34  ;;  %v774_v38 = vpop.f32.mrb[17].mxu1 }
  0xfd   :  { %v356_v39 = vpop.f32.mrb[18].mxu0  ;;  %v460_v40 = vpop.f32.mrb[18].mxu1 }
  0xfe   :  { %v528_v41 = vmax.f32 %v354_v35, 0.0  ;;  %v357_v42 = vadd.f32 %v1016_v31, %v356_v39  ;;  %v723_v43 = vpop.f32.mrb[19].mxu0  ;;  %v554_v44 = vmax.f32 %v458_v37, 0.0  ;;  %v461_v45 = vadd.f32 %v1016_v31, %v460_v40  ;;  %v775_v46 = vpop.f32.mrb[19].mxu1 }
 0x100   :  { %578 = vst [vmem:[%s1221_s3 + $0x40] sm:$0xff] %v528_v41  ;;  %v529_v47 = vmax.f32 %v357_v42, 0.0  ;;  %604 = vst [vmem:[%s1221_s3 + $0x110] sm:$0xff] %v554_v44  ;;  %v555_v48 = vmax.f32 %v461_v45, 0.0 }
 0x102   :  { %579 = vst [vmem:[%s1221_s3 + $0x48] sm:$0xff] %v529_v47  ;;  %605 = vst [vmem:[%s1221_s3 + $0x118] sm:$0xff] %v555_v48 }
 0x103   :  { %v361_v49 = vpop.f32.mrb[20].mxu0  ;;  %v465_v50 = vpop.f32.mrb[20].mxu1 }
 0x104   :  { %v362_v51 = vadd.f32 %v1016_v31, %v361_v49  ;;  %v726_v52 = vpop.f32.mrb[21].mxu0  ;;  %v466_v53 = vadd.f32 %v1016_v31, %v465_v50  ;;  %v778_v54 = vpop.f32.mrb[21].mxu1 }
 0x105   :  { %v364_v55 = vpop.f32.mrb[22].mxu0  ;;  %v468_v56 = vpop.f32.mrb[22].mxu1 }
 0x106   :  { %v530_v57 = vmax.f32 %v362_v51, 0.0  ;;  %v365_v58 = vadd.f32 %v1016_v31, %v364_v55  ;;  %v727_v59 = vpop.f32.mrb[23].mxu0  ;;  %v556_v60 = vmax.f32 %v466_v53, 0.0  ;;  %v469_v61 = vadd.f32 %v1016_v31, %v468_v56  ;;  %v779_v62 = vpop.f32.mrb[23].mxu1 }
 0x108   :  { %580 = vst [vmem:[%s1221_s3 + $0x50] sm:$0xff] %v530_v57  ;;  %v531_v63 = vmax.f32 %v365_v58, 0.0  ;;  %606 = vst [vmem:[%s1221_s3 + $0x120] sm:$0xff] %v556_v60  ;;  %v557_v0 = vmax.f32 %v469_v61, 0.0 }
 0x10a   :  { %581 = vst [vmem:[%s1221_s3 + $0x58] sm:$0xff] %v531_v63  ;;  %607 = vst [vmem:[%s1221_s3 + $0x128] sm:$0xff] %v557_v0 }
 0x10b   :  { %v369_v1 = vpop.f32.mrb[24].mxu0  ;;  %v473_v2 = vpop.f32.mrb[24].mxu1 }
 0x10c   :  { %v370_v3 = vadd.f32 %v1016_v31, %v369_v1  ;;  %v730_v4 = vpop.f32.mrb[25].mxu0  ;;  %v474_v5 = vadd.f32 %v1016_v31, %v473_v2  ;;  %v782_v6 = vpop.f32.mrb[25].mxu1 }
 0x10d   :  { %v372_v7 = vpop.f32.mrb[26].mxu0  ;;  %v476_v8 = vpop.f32.mrb[26].mxu1 }
 0x10e   :  { %v532_v9 = vmax.f32 %v370_v3, 0.0  ;;  %v373_v10 = vadd.f32 %v1016_v31, %v372_v7  ;;  %v731_v11 = vpop.f32.mrb[27].mxu0  ;;  %v558_v12 = vmax.f32 %v474_v5, 0.0  ;;  %v477_v13 = vadd.f32 %v1016_v31, %v476_v8  ;;  %v783_v14 = vpop.f32.mrb[27].mxu1 }
 0x110   :  { %582 = vst [vmem:[%s1221_s3 + $0x60] sm:$0xff] %v532_v9  ;;  %v533_v15 = vmax.f32 %v373_v10, 0.0  ;;  %608 = vst [vmem:[%s1221_s3 + $0x130] sm:$0xff] %v558_v12  ;;  %v559_v16 = vmax.f32 %v477_v13, 0.0 }
 0x112   :  { %583 = vst [vmem:[%s1221_s3 + $0x68] sm:$0xff] %v533_v15  ;;  %609 = vst [vmem:[%s1221_s3 + $0x138] sm:$0xff] %v559_v16 }
 0x113   :  { %v377_v17 = vpop.f32.mrb[28].mxu0  ;;  %v481_v18 = vpop.f32.mrb[28].mxu1 }
 0x114   :  { %v378_v19 = vadd.f32 %v1016_v31, %v377_v17  ;;  %v734_v20 = vpop.f32.mrb[29].mxu0  ;;  %v482_v21 = vadd.f32 %v1016_v31, %v481_v18  ;;  %v786_v22 = vpop.f32.mrb[29].mxu1 }
 0x115   :  { %v380_v23 = vpop.f32.mrb[30].mxu0  ;;  %v484_v24 = vpop.f32.mrb[30].mxu1 }
 0x116   :  { %v534_v25 = vmax.f32 %v378_v19, 0.0  ;;  %v381_v26 = vadd.f32 %v1016_v31, %v380_v23  ;;  %v735_v27 = vpop.f32.mrb[31].mxu0  ;;  %v560_v28 = vmax.f32 %v482_v21, 0.0  ;;  %v485_v29 = vadd.f32 %v1016_v31, %v484_v24  ;;  %v787_v30 = vpop.f32.mrb[31].mxu1 }
 0x118   :  { %584 = vst [vmem:[%s1221_s3 + $0x70] sm:$0xff] %v534_v25  ;;  %v535_v32 = vmax.f32 %v381_v26, 0.0  ;;  %610 = vst [vmem:[%s1221_s3 + $0x140] sm:$0xff] %v560_v28  ;;  %v561_v33 = vmax.f32 %v485_v29, 0.0 }
 0x11a   :  { %585 = vst [vmem:[%s1221_s3 + $0x78] sm:$0xff] %v535_v32  ;;  %611 = vst [vmem:[%s1221_s3 + $0x148] sm:$0xff] %v561_v33 }
 0x11b   :  { %v385_v34 = vpop.f32.mrb[32].mxu0  ;;  %v489_v35 = vpop.f32.mrb[32].mxu1 }
 0x11c   :  { %v386_v36 = vadd.f32 %v1016_v31, %v385_v34  ;;  %v738_v37 = vpop.f32.mrb[33].mxu0  ;;  %v490_v38 = vadd.f32 %v1016_v31, %v489_v35  ;;  %v790_v39 = vpop.f32.mrb[33].mxu1 }
 0x11d   :  { %v388_v40 = vpop.f32.mrb[34].mxu0  ;;  %v492_v41 = vpop.f32.mrb[34].mxu1 }
 0x11e   :  { %v536_v42 = vmax.f32 %v386_v36, 0.0  ;;  %v389_v43 = vadd.f32 %v1016_v31, %v388_v40  ;;  %v739_v44 = vpop.f32.mrb[35].mxu0  ;;  %v562_v45 = vmax.f32 %v490_v38, 0.0  ;;  %v493_v46 = vadd.f32 %v1016_v31, %v492_v41  ;;  %v791_v47 = vpop.f32.mrb[35].mxu1 }
 0x120   :  { %586 = vst [vmem:[%s1221_s3 + $0x80] sm:$0xff] %v536_v42  ;;  %v537_v48 = vmax.f32 %v389_v43, 0.0  ;;  %612 = vst [vmem:[%s1221_s3 + $0x150] sm:$0xff] %v562_v45  ;;  %v563_v49 = vmax.f32 %v493_v46, 0.0 }
 0x122   :  { %587 = vst [vmem:[%s1221_s3 + $0x88] sm:$0xff] %v537_v48  ;;  %613 = vst [vmem:[%s1221_s3 + $0x158] sm:$0xff] %v563_v49 }
 0x123   :  { %v393_v50 = vpop.f32.mrb[36].mxu0  ;;  %v497_v51 = vpop.f32.mrb[36].mxu1 }
 0x124   :  { %v394_v52 = vadd.f32 %v1016_v31, %v393_v50  ;;  %v742_v53 = vpop.f32.mrb[37].mxu0  ;;  %v498_v54 = vadd.f32 %v1016_v31, %v497_v51  ;;  %v794_v55 = vpop.f32.mrb[37].mxu1 }
 0x125   :  { %v396_v56 = vpop.f32.mrb[38].mxu0  ;;  %v500_v57 = vpop.f32.mrb[38].mxu1 }
 0x126   :  { %v538_v58 = vmax.f32 %v394_v52, 0.0  ;;  %v397_v59 = vadd.f32 %v1016_v31, %v396_v56  ;;  %v743_v60 = vpop.f32.mrb[39].mxu0  ;;  %v564_v61 = vmax.f32 %v498_v54, 0.0  ;;  %v501_v62 = vadd.f32 %v1016_v31, %v500_v57  ;;  %v795_v63 = vpop.f32.mrb[39].mxu1 }
 0x128   :  { %588 = vst [vmem:[%s1221_s3 + $0x90] sm:$0xff] %v538_v58  ;;  %v539_v0 = vmax.f32 %v397_v59, 0.0  ;;  %614 = vst [vmem:[%s1221_s3 + $0x160] sm:$0xff] %v564_v61  ;;  %v565_v1 = vmax.f32 %v501_v62, 0.0 }
 0x12a   :  { %589 = vst [vmem:[%s1221_s3 + $0x98] sm:$0xff] %v539_v0  ;;  %615 = vst [vmem:[%s1221_s3 + $0x168] sm:$0xff] %v565_v1 }
 0x12b   :  { %v401_v2 = vpop.f32.mrb[40].mxu0  ;;  %v505_v3 = vpop.f32.mrb[40].mxu1 }
 0x12c   :  { %v402_v4 = vadd.f32 %v1016_v31, %v401_v2  ;;  %v746_v5 = vpop.f32.mrb[41].mxu0  ;;  %v506_v6 = vadd.f32 %v1016_v31, %v505_v3  ;;  %v798_v7 = vpop.f32.mrb[41].mxu1 }
 0x12d   :  { %v404_v8 = vpop.f32.mrb[42].mxu0  ;;  %v508_v9 = vpop.f32.mrb[42].mxu1 }
 0x12e   :  { %v540_v10 = vmax.f32 %v402_v4, 0.0  ;;  %v405_v11 = vadd.f32 %v1016_v31, %v404_v8  ;;  %v747_v12 = vpop.f32.mrb[43].mxu0  ;;  %v566_v13 = vmax.f32 %v506_v6, 0.0  ;;  %v509_v14 = vadd.f32 %v1016_v31, %v508_v9  ;;  %v799_v15 = vpop.f32.mrb[43].mxu1 }
 0x130   :  { %590 = vst [vmem:[%s1221_s3 + $0xa0] sm:$0xff] %v540_v10  ;;  %v541_v16 = vmax.f32 %v405_v11, 0.0  ;;  %616 = vst [vmem:[%s1221_s3 + $0x170] sm:$0xff] %v566_v13  ;;  %v567_v17 = vmax.f32 %v509_v14, 0.0 }
 0x132   :  { %591 = vst [vmem:[%s1221_s3 + $0xa8] sm:$0xff] %v541_v16  ;;  %617 = vst [vmem:[%s1221_s3 + $0x178] sm:$0xff] %v567_v17 }
 0x133   :  { %v409_v18 = vpop.f32.mrb[44].mxu0  ;;  %v513_v19 = vpop.f32.mrb[44].mxu1 }
 0x134   :  { %v410_v20 = vadd.f32 %v1016_v31, %v409_v18  ;;  %v750_v21 = vpop.f32.mrb[45].mxu0  ;;  %v514_v22 = vadd.f32 %v1016_v31, %v513_v19  ;;  %v802_v23 = vpop.f32.mrb[45].mxu1 }
 0x135   :  { %v412_v24 = vpop.f32.mrb[46].mxu0  ;;  %v516_v25 = vpop.f32.mrb[46].mxu1 }
 0x136   :  { %v542_v26 = vmax.f32 %v410_v20, 0.0  ;;  %v413_v27 = vadd.f32 %v1016_v31, %v412_v24  ;;  %v751_v28 = vpop.f32.mrb[47].mxu0  ;;  %v568_v29 = vmax.f32 %v514_v22, 0.0  ;;  %v517_v30 = vadd.f32 %v1016_v31, %v516_v25  ;;  %v803_v32 = vpop.f32.mrb[47].mxu1 }
 0x138   :  { %592 = vst [vmem:[%s1221_s3 + $0xb0] sm:$0xff] %v542_v26  ;;  %v543_v33 = vmax.f32 %v413_v27, 0.0  ;;  %618 = vst [vmem:[%s1221_s3 + $0x180] sm:$0xff] %v568_v29  ;;  %v569_v34 = vmax.f32 %v517_v30, 0.0 }
 0x13a   :  { %593 = vst [vmem:[%s1221_s3 + $0xb8] sm:$0xff] %v543_v33  ;;  %619 = vst [vmem:[%s1221_s3 + $0x188] sm:$0xff] %v569_v34 }
 0x13b   :  { %v417_v35 = vpop.f32.mrb[48].mxu0 }
 0x13c   :  { %v418_v36 = vadd.f32 %v1016_v31, %v417_v35  ;;  %v754_v37 = vpop.f32.mrb[49].mxu0 }
 0x13d   :  { %v420_v38 = vpop.f32.mrb[50].mxu0 }
 0x13e   :  { %v544_v39 = vmax.f32 %v418_v36, 0.0  ;;  %v421_v40 = vadd.f32 %v1016_v31, %v420_v38  ;;  %v755_v41 = vpop.f32.mrb[51].mxu0 }
 0x140   :  { %594 = vst [vmem:[%s1221_s3 + $0xc0] sm:$0xff] %v544_v39  ;;  %v545_v42 = vmax.f32 %v421_v40, 0.0 }
 0x142   :  { %595 = vst [vmem:[%s1221_s3 + $0xc8] sm:$0xff] %v545_v42 }

// kernel: lnn_forward.6
= control target key start
LH: loop header
LB: loop body
LE: loop exit
PB: predicated region body
PF: predicated region fallthrough
CT: control target
= control target key end

     0   :  { %v550_v0 = vmov 0   ;;  %vm188_vm0 = vcmask 130048   ;;  %v57_v26 = vlaneseq  ;;  %s828_s1 = inlined_call_operand.vmem [shape: bf16[144,128], index: 1, kind: input, shape index: {}]   ;;  %s829_s0 = inlined_call_operand.vmem [shape: bf16[128,144], index: 0, kind: input, shape index: {}]   ;;  %s830_s2 = inlined_call_operand.vmem [shape: f32[1,128], index: 2, kind: input, shape index: {}]   ;;  %s831_s3 = inlined_call_operand.vmem [shape: f32[1,128], index: 3, kind: input, shape index: {}]   ;;  %s832_s4 = inlined_call_operand.vmem [shape: f32[1,128], index: 4, kind: input, shape index: {}]   ;;  %s833_s5 = inlined_call_operand.vmem [shape: f32[128,128], index: 5, kind: output, shape index: {}]  }
   0x1   :  { %213 = vmatprep.subr.bf16.mxu0 %v550_v0  ;;  %v515_v1 = vld [vmem:[%s828_s1] sm:$0xff]   ;;  %496 = vmatprep.subr.bf16.mxu1 %v550_v0  ;;  %v516_v2 = vld [vmem:[%s828_s1 + $0x8] sm:$0xff]   ;;  %v517_v3 = vld [vmem:[%s828_s1 + $0x10] sm:$0xff]  }
   0x2   :  { %214 = vmatpush1.bf16.msra.mxu0 %v515_v1  ;;  %505 = vmatpush1.bf16.msra.mxu1 %v515_v1  ;;  %v518_v4 = vld [vmem:[%s828_s1 + $0x18] sm:$0xff]   ;;  %v526_v5 = vld [vmem:[%s829_s0 + $0x4] ss:$8 sps:$4 sm:$0xff]   ;;  %v521_v9 = vld [vmem:[%s828_s1 + $0x30] sm:$0xff]   ;;  %v58_v27 = vshrl.u32 %v57_v26, 7 }
   0x3   :  { %215 = vmatprep.subr.bf16.mxu0 %v550_v0  ;;  %497 = vmatprep.subr.bf16.mxu1 %v550_v0  ;;  %v532_v6 = vld [vmem:[%s829_s0 + $0x44] ss:$8 sps:$4 sm:$0xff]   ;;  %v522_v10 = vld [vmem:[%s828_s1 + $0x38] sm:$0xff]   ;;  %v524_v12 = vld [vmem:[%s829_s0] ss:$8 sps:$4 sm:$0xff]  }
   0x4   :  { %488 = vmatprep.mubr.msk.bf16.mxu0 %vm188_vm0, %v526_v5  ;;  %v519_v7 = vld [vmem:[%s828_s1 + $0x20] sm:$0xff]   ;;  %492 = vmatprep.mubr.msk.bf16.mxu1 %vm188_vm0, %v532_v6  ;;  %v520_v8 = vld [vmem:[%s828_s1 + $0x28] sm:$0xff]   ;;  %v527_v14 = vld [vmem:[%s829_s0 + $0x14] ss:$8 sps:$4 sm:$0xff]   ;;  %v664_v30 = vsub.s32 0, %v58_v27 }
   0x5   :  { %v523_v11 = vld [vmem:[%s828_s1 + $0x40] sm:$0xff]   ;;  %v536_v15 = vld [vmem:[%s829_s0 + $0x54] ss:$8 sps:$4 sm:$0xff]   ;;  %v529_v16 = vld [vmem:[%s829_s0 + $0x10] ss:$8 sps:$4 sm:$0xff]  }
   0x6   :  { %216 = vmatpush1.bf16.msra.mxu0 %v516_v2  ;;  %506 = vmatpush1.bf16.msra.mxu1 %v516_v2  ;;  %v530_v13 = vld [vmem:[%s829_s0 + $0x40] ss:$8 sps:$4 sm:$0xff]   ;;  %v538_v17 = vld [vmem:[%s829_s0 + $0x50] ss:$8 sps:$4 sm:$0xff]   ;;  %v533_v18 = vld [vmem:[%s829_s0 + $0x24] ss:$8 sps:$4 sm:$0xff]  }
   0x7   :  { %217 = vmatprep.subr.bf16.mxu0 %v550_v0  ;;  %498 = vmatprep.subr.bf16.mxu1 %v550_v0  ;;  %v542_v19 = vld [vmem:[%s829_s0 + $0x64] ss:$8 sps:$4 sm:$0xff]   ;;  %v535_v20 = vld [vmem:[%s829_s0 + $0x20] ss:$8 sps:$4 sm:$0xff]   ;;  %v539_v22 = vld [vmem:[%s829_s0 + $0x34] ss:$8 sps:$4 sm:$0xff]  }
   0x8   :  { %v544_v21 = vld [vmem:[%s829_s0 + $0x60] ss:$8 sps:$4 sm:$0xff]   ;;  %v545_v23 = vld [vmem:[%s829_s0 + $0x74] ss:$8 sps:$4 sm:$0xff]   ;;  %v541_v24 = vld [vmem:[%s829_s0 + $0x30] ss:$8 sps:$4 sm:$0xff]  }
   0x9   :  { %v547_v25 = vld [vmem:[%s829_s0 + $0x70] ss:$8 sps:$4 sm:$0xff]   ;;  %v669_v33 = vld [vmem:[%s830_s2] sm:$0x1] }
   0xa   :  { %218 = vmatpush1.bf16.msra.mxu0 %v517_v3  ;;  %507 = vmatpush1.bf16.msra.mxu1 %v517_v3  ;;  %v673_v38 = vrot.slane %v669_v33, %v664_v30 }
   0xb   :  { %219 = vmatprep.subr.bf16.mxu0 %v550_v0  ;;  %499 = vmatprep.subr.bf16.mxu1 %v550_v0 }
   0xe   :  { %220 = vmatpush1.bf16.msra.mxu0 %v518_v4  ;;  %508 = vmatpush1.bf16.msra.mxu1 %v518_v4 }
   0xf   :  { %221 = vmatprep.subr.bf16.mxu0 %v550_v0  ;;  %500 = vmatprep.subr.bf16.mxu1 %v550_v0 }
  0x12   :  { %222 = vmatpush1.bf16.msra.mxu0 %v519_v7  ;;  %509 = vmatpush1.bf16.msra.mxu1 %v519_v7 }
  0x13   :  { %223 = vmatprep.subr.bf16.mxu0 %v550_v0  ;;  %501 = vmatprep.subr.bf16.mxu1 %v550_v0 }
  0x16   :  { %224 = vmatpush1.bf16.msra.mxu0 %v520_v8  ;;  %510 = vmatpush1.bf16.msra.mxu1 %v520_v8 }
  0x17   :  { %225 = vmatprep.subr.bf16.mxu0 %v550_v0  ;;  %502 = vmatprep.subr.bf16.mxu1 %v550_v0 }
  0x1a   :  { %226 = vmatpush1.bf16.msra.mxu0 %v521_v9  ;;  %511 = vmatpush1.bf16.msra.mxu1 %v521_v9 }
  0x1b   :  { %227 = vmatprep.subr.bf16.mxu0 %v550_v0  ;;  %503 = vmatprep.subr.bf16.mxu1 %v550_v0 }
  0x1e   :  { %228 = vmatpush1.bf16.msra.mxu0 %v522_v10  ;;  %512 = vmatpush1.bf16.msra.mxu1 %v522_v10 }
  0x1f   :  { %229 = vmatprep.subr.bf16.mxu0 %v550_v0  ;;  %504 = vmatprep.subr.bf16.mxu1 %v550_v0 }
  0x22   :  { %230 = vmatpush1.bf16.msra.mxu0 %v523_v11  ;;  %513 = vmatpush1.bf16.msra.mxu1 %v523_v11 }
  0x25   :  { %246 = vmatmul.mubr.bf16.vlgmr.msra.gmra.mrb[0].mxu0 %v524_v12  ;;  %278 = vmatmul.mubr.bf16.vlgmr.msra.gmra.mrb[0].mxu1 %v530_v13 }
  0x26   :  { %489 = vmatprep.mubr.msk.bf16.mxu0 %vm188_vm0, %v527_v14  ;;  %493 = vmatprep.mubr.msk.bf16.mxu1 %vm188_vm0, %v536_v15 }
  0x2d   :  { %254 = vmatmul.mubr.bf16.gmra.mrb[4].mxu0 %v529_v16  ;;  %286 = vmatmul.mubr.bf16.gmra.mrb[4].mxu1 %v538_v17 }
  0x2e   :  { %490 = vmatprep.mubr.msk.bf16.mxu0 %vm188_vm0, %v533_v18  ;;  %494 = vmatprep.mubr.msk.bf16.mxu1 %vm188_vm0, %v542_v19 }
  0x35   :  { %262 = vmatmul.mubr.bf16.gmra.mrb[8].mxu0 %v535_v20  ;;  %294 = vmatmul.mubr.bf16.gmra.mrb[8].mxu1 %v544_v21 }
  0x36   :  { %491 = vmatprep.mubr.msk.bf16.mxu0 %vm188_vm0, %v539_v22  ;;  %495 = vmatprep.mubr.msk.bf16.mxu1 %vm188_vm0, %v545_v23 }
  0x3d   :  { %270 = vmatmul.mubr.bf16.gmra.mrb[12].mxu0 %v541_v24  ;;  %302 = vmatmul.mubr.bf16.gmra.mrb[12].mxu1 %v547_v25 }
  0xf8   :  { %v247_v28 = vpop.f32.mrb[0].mxu0  ;;  %v279_v29 = vpop.f32.mrb[0].mxu1 }
  0xf9   :  { %v249_v31 = vpop.f32.mrb[1].mxu0  ;;  %v281_v32 = vpop.f32.mrb[1].mxu1  ;;  %v679_v42 = vadd.f32 %v247_v28, %v673_v38  ;;  %v715_v17 = vadd.f32 %v279_v29, %v673_v38 }
  0xfa   :  { %v250_v34 = vpop.f32.mrb[2].mxu0  ;;  %v282_v35 = vpop.f32.mrb[2].mxu1 }
  0xfb   :  { %v252_v36 = vpop.f32.mrb[3].mxu0  ;;  %v284_v37 = vpop.f32.mrb[3].mxu1  ;;  %v676_v39 = vadd.f32 %v250_v34, %v673_v38  ;;  %v333_v51 = vmul.f32 %v679_v42, %v679_v42  ;;  %v724_v26 = vadd.f32 %v282_v35, %v673_v38  ;;  %v341_v31 = vmul.f32 %v715_v17, %v715_v17 }
  0xfd   :  { %v334_v48 = vmul.f32 %v676_v39, %v676_v39  ;;  %v310_v52 = vadd.f32 %v676_v39, %v679_v42  ;;  %v342_v37 = vmul.f32 %v724_v26, %v724_v26 }
  0xff   :  { %v349_v55 = vadd.f32 %v334_v48, %v333_v51 }
 0x100   :  { %v255_v40 = vpop.f32.mrb[4].mxu0  ;;  %v287_v41 = vpop.f32.mrb[4].mxu1 }
 0x101   :  { %v682_v43 = vadd.f32 %v255_v40, %v673_v38  ;;  %v257_v44 = vpop.f32.mrb[5].mxu0  ;;  %v289_v45 = vpop.f32.mrb[5].mxu1  ;;  %v732_v32 = vadd.f32 %v287_v41, %v673_v38 }
 0x102   :  { %v258_v46 = vpop.f32.mrb[6].mxu0  ;;  %v290_v47 = vpop.f32.mrb[6].mxu1 }
 0x103   :  { %v260_v49 = vpop.f32.mrb[7].mxu0  ;;  %v292_v50 = vpop.f32.mrb[7].mxu1  ;;  %v335_v53 = vmul.f32 %v682_v43, %v682_v43  ;;  %v693_v54 = vadd.f32 %v258_v46, %v673_v38  ;;  %v311_v56 = vadd.f32 %v310_v52, %v682_v43  ;;  %v738_v35 = vadd.f32 %v290_v47, %v673_v38 }
 0x104   :  { %v343_v45 = vmul.f32 %v732_v32, %v732_v32 }
 0x105   :  { %v350_v59 = vadd.f32 %v349_v55, %v335_v53  ;;  %v336_v60 = vmul.f32 %v693_v54, %v693_v54  ;;  %v312_v2 = vadd.f32 %v311_v56, %v693_v54  ;;  %v344_v50 = vmul.f32 %v738_v35, %v738_v35 }
 0x107   :  { %v351_v7 = vadd.f32 %v350_v59, %v336_v60 }
 0x108   :  { %v263_v57 = vpop.f32.mrb[8].mxu0  ;;  %v295_v58 = vpop.f32.mrb[8].mxu1 }
 0x109   :  { %v699_v61 = vadd.f32 %v263_v57, %v673_v38  ;;  %v265_v62 = vpop.f32.mrb[9].mxu0  ;;  %v297_v63 = vpop.f32.mrb[9].mxu1  ;;  %v744_v48 = vadd.f32 %v295_v58, %v673_v38 }
 0x10a   :  { %v266_v0 = vpop.f32.mrb[10].mxu0  ;;  %v298_v1 = vpop.f32.mrb[10].mxu1 }
 0x10b   :  { %v337_v3 = vmul.f32 %v699_v61, %v699_v61  ;;  %v705_v4 = vadd.f32 %v266_v0, %v673_v38  ;;  %v268_v5 = vpop.f32.mrb[11].mxu0  ;;  %v300_v6 = vpop.f32.mrb[11].mxu1  ;;  %v313_v8 = vadd.f32 %v312_v2, %v699_v61  ;;  %v299_v49 = vadd.f32 %v298_v1, %v673_v38 }
 0x10c   :  { %v345_v55 = vmul.f32 %v744_v48, %v744_v48 }
 0x10d   :  { %v352_v9 = vadd.f32 %v351_v7, %v337_v3  ;;  %v338_v10 = vmul.f32 %v705_v4, %v705_v4  ;;  %v314_v13 = vadd.f32 %v313_v8, %v705_v4  ;;  %v346_v57 = vmul.f32 %v299_v49, %v299_v49 }
 0x10f   :  { %v353_v20 = vadd.f32 %v352_v9, %v338_v10 }
 0x110   :  { %v271_v11 = vpop.f32.mrb[12].mxu0  ;;  %v303_v12 = vpop.f32.mrb[12].mxu1 }
 0x111   :  { %v712_v14 = vadd.f32 %v271_v11, %v673_v38  ;;  %v273_v15 = vpop.f32.mrb[13].mxu0  ;;  %v305_v16 = vpop.f32.mrb[13].mxu1  ;;  %v304_v52 = vadd.f32 %v303_v12, %v673_v38 }
 0x112   :  { %v274_v18 = vpop.f32.mrb[14].mxu0  ;;  %v306_v19 = vpop.f32.mrb[14].mxu1  ;;  %v331_v16 = vmul.f32 0.0, %v669_v33 }
 0x113   :  { %v315_v21 = vadd.f32 %v314_v13, %v712_v14  ;;  %v339_v22 = vmul.f32 %v712_v14, %v712_v14  ;;  %v721_v23 = vadd.f32 %v274_v18, %v673_v38  ;;  %v276_v24 = vpop.f32.mrb[15].mxu0  ;;  %v308_v25 = vpop.f32.mrb[15].mxu1  ;;  %v347_v60 = vmul.f32 %v304_v52, %v304_v52 }
 0x114   :  { %v307_v62 = vadd.f32 %v306_v19, %v673_v38  ;;  %v370_v13 = vmul.f32 %v669_v33, %v669_v33 }
 0x115   :  { %v354_v27 = vadd.f32 %v353_v20, %v339_v22  ;;  %v316_v28 = vadd.f32 %v315_v21, %v721_v23  ;;  %v340_v29 = vmul.f32 %v721_v23, %v721_v23 }
 0x116   :  { %v348_v3 = vmul.f32 %v307_v62, %v307_v62  ;;  %v371_v20 = vmul.f32 0.0, %v370_v13 }
 0x117   :  { %v317_v34 = vadd.f32 %v316_v28, %v715_v17  ;;  %v355_v36 = vadd.f32 %v354_v27, %v340_v29 }
 0x119   :  { %v318_v40 = vadd.f32 %v317_v34, %v724_v26  ;;  %v356_v44 = vadd.f32 %v355_v36, %v341_v31  ;;  %v380_v36 = vld [vmem:[%s831_s3] sm:$0x1] }
 0x11b   :  { %v357_v46 = vadd.f32 %v356_v44, %v342_v37  ;;  %v319_v41 = vadd.f32 %v318_v40, %v732_v32  ;;  %v382_v40 = vld [vmem:[%s832_s4] sm:$0x1] }
 0x11d   :  { %v320_v47 = vadd.f32 %v319_v41, %v738_v35  ;;  %v358_v51 = vadd.f32 %v357_v46, %v343_v45 }
 0x11f   :  { %v321_v53 = vadd.f32 %v320_v47, %v744_v48  ;;  %v359_v56 = vadd.f32 %v358_v51, %v344_v50 }
 0x121   :  { %v360_v58 = vadd.f32 %v359_v56, %v345_v55  ;;  %v322_v59 = vadd.f32 %v321_v53, %v299_v49 }
 0x123   :  { %v361_v63 = vadd.f32 %v360_v58, %v346_v57  ;;  %v323_v0 = vadd.f32 %v322_v59, %v304_v52 }
 0x125   :  { %v362_v1 = vadd.f32 %v361_v63, %v347_v60  ;;  %v324_v2 = vadd.f32 %v323_v0, %v307_v62 }
 0x127   :  { %v325_v5 = vrot.slane %v324_v2, 4  ;;  %v363_v6 = vadd.f32 %v362_v1, %v348_v3 }
 0x129   :  { %v326_v7 = vadd.f32 %v325_v5, %v324_v2  ;;  %v364_v8 = vrot.slane %v363_v6, 4 }
 0x12b   :  { %v327_v9 = vrot.slane %v326_v7, 2  ;;  %v365_v10 = vadd.f32 %v364_v8, %v363_v6 }
 0x12d   :  { %v328_v11 = vadd.f32 %v327_v9, %v326_v7  ;;  %v366_v12 = vrot.slane %v365_v10, 2 }
 0x12f   :  { %v329_v15 = vrot.slane %v328_v11, 1  ;;  %v367_v38 = vadd.f32 %v366_v12, %v365_v10 }
 0x131   :  { %v330_v18 = vadd.f32 %v329_v15, %v328_v11  ;;  %v368_v19 = vrot.slane %v367_v38, 1 }
 0x133   :  { %v332_v21 = vsub.f32 %v330_v18, %v331_v16  ;;  %v369_v22 = vadd.f32 %v368_v19, %v367_v38 }
 0x135   :  { %v372_v24 = vsub.f32 %v369_v22, %v371_v20  ;;  %v373_v25 = vmul.f32 0.0078125, %v332_v21 }
 0x137   :  { %v374_v27 = vmul.f32 0.0078125, %v372_v24  ;;  %v375_v28 = vmul.f32 %v373_v25, %v373_v25 }
 0x139   :  { %v376_v29 = vsub.f32 %v374_v27, %v375_v28 }
 0x13b   :  { %v377_v31 = vmax.f32 %v376_v29, 0.0 }
 0x13d   :  { %v378_v34 = vadd.f32 1e-05, %v377_v31 }
 0x13f   :  { %548 = vrsqrt.f32 %v378_v34 }
 0x149   :  { %v549_v37 = vpop.eup %548 }
 0x14a   :  { %v381_v33 = vmul.f32 %v549_v37, %v380_v36 }
 0x14c   :  { %v383_v44 = vmul.f32 %v381_v33, %v373_v25  ;;  %v388_v45 = vrot.slane %v381_v33, %v664_v30 }
 0x14e   :  { %v384_v46 = vsub.f32 %v382_v40, %v383_v44  ;;  %v389_v41 = vmul.f32 %v388_v45, %v679_v42  ;;  %v390_v50 = vmul.f32 %v388_v45, %v676_v39  ;;  %v394_v47 = vmul.f32 %v388_v45, %v705_v4 }
 0x14f   :  { %v395_v51 = vmul.f32 %v388_v45, %v712_v14  ;;  %v396_v53 = vmul.f32 %v388_v45, %v721_v23  ;;  %v397_v55 = vmul.f32 %v388_v45, %v715_v17  ;;  %v398_v56 = vmul.f32 %v388_v45, %v724_v26 }
 0x150   :  { %v399_v57 = vmul.f32 %v388_v45, %v732_v32  ;;  %v400_v58 = vmul.f32 %v388_v45, %v738_v35  ;;  %v401_v59 = vmul.f32 %v388_v45, %v744_v48  ;;  %v402_v60 = vmul.f32 %v388_v45, %v299_v49 }
 0x151   :  { %v403_v42 = vmul.f32 %v388_v45, %v304_v52  ;;  %v391_v39 = vmul.f32 %v388_v45, %v682_v43  ;;  %v392_v4 = vmul.f32 %v388_v45, %v693_v54  ;;  %v404_v63 = vmul.f32 %v388_v45, %v307_v62 }
 0x152   :  { %v409_v14 = vrot.slane %v384_v46, %v664_v30  ;;  %v393_v23 = vmul.f32 %v388_v45, %v699_v61 }
 0x154   :  { %v411_v17 = vadd.f32 %v409_v14, %v389_v41  ;;  %v412_v0 = vadd.f32 %v409_v14, %v390_v50  ;;  %v413_v26 = vadd.f32 %v409_v14, %v391_v39  ;;  %v414_v1 = vadd.f32 %v409_v14, %v392_v4 }
 0x155   :  { %v415_v32 = vadd.f32 %v409_v14, %v393_v23  ;;  %v416_v2 = vadd.f32 %v409_v14, %v394_v47  ;;  %v417_v35 = vadd.f32 %v409_v14, %v395_v51  ;;  %v418_v3 = vadd.f32 %v409_v14, %v396_v53 }
 0x156   :  { %v419_v48 = vadd.f32 %v409_v14, %v397_v55  ;;  %v420_v49 = vadd.f32 %v409_v14, %v398_v56  ;;  %v421_v52 = vadd.f32 %v409_v14, %v399_v57  ;;  %v422_v5 = vadd.f32 %v409_v14, %v400_v58 }
 0x157   :  { %v423_v43 = vadd.f32 %v409_v14, %v401_v59  ;;  %v424_v6 = vadd.f32 %v409_v14, %v402_v60  ;;  %v425_v54 = vadd.f32 %v409_v14, %v403_v42  ;;  %v426_v62 = vadd.f32 %v409_v14, %v404_v63 }
 0x158   :  { %v427_v7 = vmax.f32 %v411_v17, 0.0  ;;  %v428_v30 = vmax.f32 %v412_v0, 0.0  ;;  %v429_v8 = vmax.f32 %v413_v26, 0.0  ;;  %v430_v61 = vmax.f32 %v414_v1, 0.0 }
 0x159   :  { %v431_v9 = vmax.f32 %v415_v32, 0.0  ;;  %v432_v10 = vmax.f32 %v416_v2, 0.0  ;;  %v433_v11 = vmax.f32 %v417_v35, 0.0  ;;  %v434_v12 = vmax.f32 %v418_v3, 0.0 }
 0x15a   :  { %v435_v13 = vmax.f32 %v419_v48, 0.0  ;;  %v436_v15 = vmax.f32 %v420_v49, 0.0  ;;  %v437_v16 = vmax.f32 %v421_v52, 0.0  ;;  %v438_v38 = vmax.f32 %v422_v5, 0.0  ;;  %443 = vst [vmem:[%s833_s5] sm:$0xff] %v427_v7  ;;  %444 = vst [vmem:[%s833_s5 + $0x8] sm:$0xff] %v428_v30 }
 0x15b   :  { %445 = vst [vmem:[%s833_s5 + $0x10] sm:$0xff] %v429_v8  ;;  %446 = vst [vmem:[%s833_s5 + $0x18] sm:$0xff] %v430_v61  ;;  %v439_v18 = vmax.f32 %v423_v43, 0.0  ;;  %v440_v19 = vmax.f32 %v424_v6, 0.0  ;;  %v441_v20 = vmax.f32 %v425_v54, 0.0  ;;  %v442_v21 = vmax.f32 %v426_v62, 0.0 }
 0x15c   :  { %447 = vst [vmem:[%s833_s5 + $0x20] sm:$0xff] %v431_v9  ;;  %448 = vst [vmem:[%s833_s5 + $0x28] sm:$0xff] %v432_v10 }
 0x15d   :  { %449 = vst [vmem:[%s833_s5 + $0x30] sm:$0xff] %v433_v11  ;;  %450 = vst [vmem:[%s833_s5 + $0x38] sm:$0xff] %v434_v12 }
 0x15e   :  { %451 = vst [vmem:[%s833_s5 + $0x40] sm:$0xff] %v435_v13  ;;  %452 = vst [vmem:[%s833_s5 + $0x48] sm:$0xff] %v436_v15 }
 0x15f   :  { %453 = vst [vmem:[%s833_s5 + $0x50] sm:$0xff] %v437_v16  ;;  %454 = vst [vmem:[%s833_s5 + $0x58] sm:$0xff] %v438_v38 }
 0x160   :  { %455 = vst [vmem:[%s833_s5 + $0x60] sm:$0xff] %v439_v18  ;;  %456 = vst [vmem:[%s833_s5 + $0x68] sm:$0xff] %v440_v19 }
 0x161   :  { %457 = vst [vmem:[%s833_s5 + $0x70] sm:$0xff] %v441_v20  ;;  %458 = vst [vmem:[%s833_s5 + $0x78] sm:$0xff] %v442_v21 }

// kernel: lnn_forward.7
= control target key start
LH: loop header
LB: loop body
LE: loop exit
PB: predicated region body
PF: predicated region fallthrough
CT: control target
= control target key end

     0   :  { %vm508_vm0 = vcmask 261120   ;;  %s1183_s1 = inlined_call_operand.vmem [shape: bf16[800,128], index: 1, kind: input, shape index: {}]   ;;  %s1184_s0 = inlined_call_operand.vmem [shape: bf16[32,800], index: 0, kind: input, shape index: {}]   ;;  %s1185_s2 = inlined_call_operand.vmem [shape: f32[1,128], index: 2, kind: input, shape index: {}]   ;;  %s1186_s3 = inlined_call_operand.vmem [shape: f32[32,128], index: 3, kind: output, shape index: {}]  }
   0x1   :  { %v886_v0 = vld [vmem:[%s1183_s1 + $0x40] sm:$0xff]   ;;  %v890_v4 = vld [vmem:[%s1183_s1 + $0x48] sm:$0xff]   ;;  %v894_v8 = vld [vmem:[%s1183_s1 + $0x50] sm:$0xff]  }
   0x2   :  { %v887_v1 = vld [vmem:[%s1183_s1] sm:$0xff]   ;;  %790 = vmatprep.subr.bf16.mxu0 %v886_v0  ;;  %v891_v5 = vld [vmem:[%s1183_s1 + $0x8] sm:$0xff]   ;;  %v895_v9 = vld [vmem:[%s1183_s1 + $0x10] sm:$0xff]  }
   0x3   :  { %v888_v2 = vld [vmem:[%s1183_s1 + $0xc0] sm:$0xff]   ;;  %791 = vmatpush3.bf16.msra.mxu0 %v887_v1  ;;  %v892_v6 = vld [vmem:[%s1183_s1 + $0xc8] sm:$0xff]   ;;  %v896_v10 = vld [vmem:[%s1183_s1 + $0xd0] sm:$0xff]  }
   0x4   :  { %v889_v3 = vld [vmem:[%s1183_s1 + $0x80] sm:$0xff]   ;;  %818 = vmatprep.subr.bf16.mxu1 %v888_v2  ;;  %792 = vmatprep.subr.bf16.mxu0 %v890_v4  ;;  %v893_v7 = vld [vmem:[%s1183_s1 + $0x88] sm:$0xff]   ;;  %v897_v11 = vld [vmem:[%s1183_s1 + $0x90] sm:$0xff]  }
   0x5   :  { %819 = vmatpush3.bf16.msra.mxu1 %v889_v3  ;;  %v898_v12 = vld [vmem:[%s1183_s1 + $0x58] sm:$0xff]   ;;  %v902_v16 = vld [vmem:[%s1183_s1 + $0x60] sm:$0xff]   ;;  %v906_v20 = vld [vmem:[%s1183_s1 + $0x68] sm:$0xff]  }
   0x6   :  { %820 = vmatprep.subr.bf16.mxu1 %v892_v6  ;;  %v899_v13 = vld [vmem:[%s1183_s1 + $0x18] sm:$0xff]   ;;  %v903_v17 = vld [vmem:[%s1183_s1 + $0x20] sm:$0xff]   ;;  %v907_v21 = vld [vmem:[%s1183_s1 + $0x28] sm:$0xff]  }
   0x7   :  { %793 = vmatpush3.bf16.msra.mxu0 %v891_v5  ;;  %v900_v14 = vld [vmem:[%s1183_s1 + $0xd8] sm:$0xff]   ;;  %v904_v18 = vld [vmem:[%s1183_s1 + $0xe0] sm:$0xff]   ;;  %v908_v22 = vld [vmem:[%s1183_s1 + $0xe8] sm:$0xff]  }
   0x8   :  { %794 = vmatprep.subr.bf16.mxu0 %v894_v8  ;;  %v901_v15 = vld [vmem:[%s1183_s1 + $0x98] sm:$0xff]   ;;  %v905_v19 = vld [vmem:[%s1183_s1 + $0xa0] sm:$0xff]   ;;  %v909_v23 = vld [vmem:[%s1183_s1 + $0xa8] sm:$0xff]  }
   0x9   :  { %821 = vmatpush3.bf16.msra.mxu1 %v893_v7  ;;  %v910_v24 = vld [vmem:[%s1183_s1 + $0x70] sm:$0xff]   ;;  %v914_v28 = vld [vmem:[%s1183_s1 + $0x78] sm:$0xff]   ;;  %v919_v32 = vld [vmem:[%s1184_s0 + $0x4] ss:$28 sps:$4 sm:$0xff]  }
   0xa   :  { %822 = vmatprep.subr.bf16.mxu1 %v896_v10  ;;  %v911_v25 = vld [vmem:[%s1183_s1 + $0x30] sm:$0xff]   ;;  %v915_v29 = vld [vmem:[%s1183_s1 + $0x38] sm:$0xff]   ;;  %547 = vmatprep.mubr.bf16.mxu0 %v919_v32  ;;  %v921_v34 = vld [vmem:[%s1183_s1 + $0x140] sm:$0xff]  }
   0xb   :  { %795 = vmatpush3.bf16.msra.mxu0 %v895_v9  ;;  %v912_v26 = vld [vmem:[%s1183_s1 + $0xf0] sm:$0xff]   ;;  %v916_v30 = vld [vmem:[%s1183_s1 + $0xf8] sm:$0xff]   ;;  %v922_v35 = vld [vmem:[%s1184_s0 + $0x8] ss:$28 sps:$4 sm:$0xff]  }
   0xc   :  { %796 = vmatprep.subr.bf16.mxu0 %v898_v12  ;;  %v913_v27 = vld [vmem:[%s1183_s1 + $0xb0] sm:$0xff]   ;;  %v917_v31 = vld [vmem:[%s1184_s0] ss:$28 sps:$4 sm:$0xff]   ;;  %v924_v36 = vld [vmem:[%s1184_s0 + $0xc] ss:$28 sps:$4 sm:$0xff]  }
   0xd   :  { %823 = vmatpush3.bf16.msra.mxu1 %v897_v11  ;;  %v920_v33 = vld [vmem:[%s1183_s1 + $0xb8] sm:$0xff]   ;;  %v925_v37 = vld [vmem:[%s1183_s1 + $0x100] sm:$0xff]   ;;  %596 = vmatprep.mubr.bf16.mxu1 %v924_v36  ;;  %v926_v38 = vld [vmem:[%s1183_s1 + $0x148] sm:$0xff]  }
   0xe   :  { %824 = vmatprep.subr.bf16.mxu1 %v900_v14  ;;  %v927_v39 = vld [vmem:[%s1183_s1 + $0x108] sm:$0xff]   ;;  %v928_v40 = vld [vmem:[%s1183_s1 + $0x150] sm:$0xff]   ;;  %v930_v42 = vld [vmem:[%s1183_s1 + $0x158] sm:$0xff]  }
   0xf   :  { %797 = vmatpush3.bf16.msra.mxu0 %v899_v13  ;;  %v929_v41 = vld [vmem:[%s1183_s1 + $0x110] sm:$0xff]   ;;  %v934_v43 = vld [vmem:[%s1184_s0 + $0x3c] ss:$28 sps:$4 sm:$0xff]   ;;  %v932_v46 = vld [vmem:[%s1183_s1 + $0x160] sm:$0xff]  }
  0x10   :  { %798 = vmatprep.subr.bf16.mxu0 %v902_v16  ;;  %v931_v44 = vld [vmem:[%s1183_s1 + $0x118] sm:$0xff]   ;;  %v939_v47 = vld [vmem:[%s1184_s0 + $0x44] ss:$28 sps:$4 sm:$0xff]   ;;  %v936_v50 = vld [vmem:[%s1183_s1 + $0x168] sm:$0xff]  }
  0x11   :  { %825 = vmatpush3.bf16.msra.mxu1 %v901_v15  ;;  %v937_v45 = vld [vmem:[%s1184_s0 + $0x38] ss:$28 sps:$4 sm:$0xff]   ;;  %v941_v48 = vld [vmem:[%s1184_s0 + $0x40] ss:$28 sps:$4 sm:$0xff]   ;;  %v938_v52 = vld [vmem:[%s1183_s1 + $0x128] sm:$0xff]  }
  0x12   :  { %826 = vmatprep.subr.bf16.mxu1 %v904_v18  ;;  %v933_v49 = vld [vmem:[%s1183_s1 + $0x120] sm:$0xff]   ;;  %v942_v53 = vld [vmem:[%s1183_s1 + $0x170] sm:$0xff]   ;;  %v950_v56 = vld [vmem:[%s1183_s1 + $0x188] sm:$0xff]  }
  0x13   :  { %799 = vmatpush3.bf16.msra.mxu0 %v903_v17  ;;  %v944_v51 = vld [vmem:[%s1183_s1 + $0x180] sm:$0xff]   ;;  %v949_v54 = vld [vmem:[%s1184_s0 + $0x14] ss:$28 sps:$4 sm:$0xff]   ;;  %v945_v59 = vld [vmem:[%s1183_s1 + $0x178] sm:$0xff]  }
  0x14   :  { %800 = vmatprep.subr.bf16.mxu0 %v906_v20  ;;  %v943_v55 = vld [vmem:[%s1183_s1 + $0x130] sm:$0xff]   ;;  %v946_v60 = vld [vmem:[%s1183_s1 + $0x138] sm:$0xff]   ;;  %v953_v62 = vld [vmem:[%s1184_s0 + $0x4c] ss:$28 sps:$4 sm:$0xff]  }
  0x15   :  { %827 = vmatpush3.bf16.msra.mxu1 %v905_v19  ;;  %v951_v57 = vld [vmem:[%s1184_s0 + $0x18] ss:$28 sps:$4 sm:$0xff]   ;;  %v952_v58 = vld [vmem:[%s1184_s0 + $0x50] ss:$28 sps:$4 sm:$0xff]   ;;  %v955_v63 = vld [vmem:[%s1184_s0 + $0x48] ss:$28 sps:$4 sm:$0xff]  }
  0x16   :  { %828 = vmatprep.subr.bf16.mxu1 %v908_v22  ;;  %v947_v61 = vld [vmem:[%s1184_s0 + $0x10] ss:$28 sps:$4 sm:$0xff]   ;;  %v723_v1 = vld [vmem:[%s1185_s2] ss:$0 sm:$0xff] }
  0x17   :  { %801 = vmatpush3.bf16.msra.mxu0 %v907_v21 }
  0x18   :  { %802 = vmatprep.subr.bf16.mxu0 %v910_v24 }
  0x19   :  { %829 = vmatpush3.bf16.msra.mxu1 %v909_v23 }
  0x1a   :  { %830 = vmatprep.subr.bf16.mxu1 %v912_v26 }
  0x1b   :  { %803 = vmatpush3.bf16.msra.mxu0 %v911_v25 }
  0x1c   :  { %804 = vmatprep.subr.bf16.mxu0 %v914_v28 }
  0x1d   :  { %831 = vmatpush3.bf16.msra.mxu1 %v913_v27 }
  0x1e   :  { %832 = vmatprep.subr.bf16.mxu1 %v916_v30 }
  0x1f   :  { %805 = vmatpush3.bf16.msra.mxu0 %v915_v29 }
  0x20   :  { %846 = vmatprep.subr.bf16.mxu0 %v921_v34 }
  0x21   :  { %833 = vmatpush3.bf16.msra.mxu1 %v920_v33 }
  0x22   :  { %548 = vmatmul.mubr.bf16.vlgmr.msra.gmra.mrb[0].mxu0 %v917_v31  ;;  %878 = vmatprep.subr.bf16.mxu1 %v944_v51 }
  0x23   :  { %847 = vmatpush3.bf16.msra.mxu0 %v925_v37  ;;  %555 = vmatprep.mubr.bf16.mxu0 %v934_v43 }
  0x24   :  { %597 = vmatmul.mubr.bf16.vlgmr.msra.gmra.mrb[0].mxu1 %v922_v35  ;;  %848 = vmatprep.subr.bf16.mxu0 %v926_v38 }
  0x25   :  { %604 = vmatprep.mubr.bf16.mxu1 %v939_v47  ;;  %879 = vmatpush3.bf16.msra.mxu1 %v944_v51 }
  0x26   :  { %880 = vmatprep.subr.bf16.mxu1 %v950_v56 }
  0x27   :  { %849 = vmatpush3.bf16.msra.mxu0 %v927_v39 }
  0x28   :  { %850 = vmatprep.subr.bf16.mxu0 %v928_v40 }
  0x29   :  { %881 = vmatpush3.bf16.msra.mxu1 %v950_v56 }
  0x2a   :  { %556 = vmatmul.mubr.bf16.gmra.mrb[4].mxu0 %v937_v45 }
  0x2b   :  { %851 = vmatpush3.bf16.msra.mxu0 %v929_v41  ;;  %645 = vmatprep.mubr.bf16.mxu0 %v949_v54 }
  0x2c   :  { %852 = vmatprep.subr.bf16.mxu0 %v930_v42  ;;  %605 = vmatmul.mubr.bf16.gmra.mrb[4].mxu1 %v941_v48 }
  0x2d   :  { %882 = vmatprep.mubr.msk.bf16.mxu1 %vm508_vm0, %v951_v57 }
  0x2f   :  { %853 = vmatpush3.bf16.msra.mxu0 %v931_v44 }
  0x30   :  { %854 = vmatprep.subr.bf16.mxu0 %v932_v46 }
  0x33   :  { %855 = vmatpush3.bf16.msra.mxu0 %v933_v49 }
  0x34   :  { %856 = vmatprep.subr.bf16.mxu0 %v936_v50  ;;  %883 = vmatmul.mubr.msk.bf16.vlgmr.msra.gmra.mrb[8].mxu1 %vm508_vm0, %v952_v58 }
  0x37   :  { %857 = vmatpush3.bf16.msra.mxu0 %v938_v52 }
  0x38   :  { %858 = vmatprep.subr.bf16.mxu0 %v942_v53 }
  0x3b   :  { %859 = vmatpush3.bf16.msra.mxu0 %v943_v55 }
  0x3c   :  { %860 = vmatprep.subr.bf16.mxu0 %v945_v59 }
  0x3f   :  { %861 = vmatpush3.bf16.msra.mxu0 %v946_v60 }
  0x42   :  { %646 = vmatmul.mubr.bf16.vlgmr.msra.gmra.mrb[8].mxu0 %v947_v61 }
  0x43   :  { %653 = vmatprep.mubr.bf16.mxu0 %v953_v62 }
  0x4a   :  { %654 = vmatmul.mubr.bf16.gmra.mrb[12].mxu0 %v955_v63 }
  0xf5   :  { %v806_v0 = vpop.f32.mrb[0].mxu0 }
  0xf6   :  { %v807_v2 = vpop.f32.mrb[1].mxu0 }
  0xf7   :  { %v808_v3 = vadd.f32 %v807_v2, %v806_v0  ;;  %v809_v4 = vpop.f32.mrb[2].mxu0  ;;  %v834_v5 = vpop.f32.mrb[0].mxu1 }
  0xf8   :  { %v810_v6 = vpop.f32.mrb[3].mxu0  ;;  %v835_v9 = vpop.f32.mrb[1].mxu1 }
  0xf9   :  { %v550_v7 = vadd.f32 %v808_v3, %v723_v1  ;;  %v811_v8 = vadd.f32 %v810_v6, %v809_v4  ;;  %v836_v10 = vadd.f32 %v835_v9, %v834_v5  ;;  %v837_v11 = vpop.f32.mrb[2].mxu1 }
  0xfa   :  { %v838_v13 = vpop.f32.mrb[3].mxu1 }
  0xfb   :  { %v553_v12 = vadd.f32 %v811_v8, %v723_v1  ;;  %v599_v14 = vadd.f32 %v836_v10, %v550_v7  ;;  %v839_v15 = vadd.f32 %v838_v13, %v837_v11 }
  0xfd   :  { %v602_v16 = vadd.f32 %v839_v15, %v553_v12  ;;  %v812_v17 = vpop.f32.mrb[4].mxu0 }
  0xfe   :  { %v813_v18 = vpop.f32.mrb[5].mxu0 }
  0xff   :  { %v814_v19 = vadd.f32 %v813_v18, %v812_v17  ;;  %v815_v20 = vpop.f32.mrb[6].mxu0  ;;  %v840_v21 = vpop.f32.mrb[4].mxu1 }
 0x100   :  { %v816_v22 = vpop.f32.mrb[7].mxu0  ;;  %v841_v25 = vpop.f32.mrb[5].mxu1 }
 0x101   :  { %v558_v23 = vadd.f32 %v814_v19, %v723_v1  ;;  %v817_v24 = vadd.f32 %v816_v22, %v815_v20  ;;  %v842_v26 = vadd.f32 %v841_v25, %v840_v21  ;;  %v843_v27 = vpop.f32.mrb[6].mxu1 }
 0x102   :  { %v844_v29 = vpop.f32.mrb[7].mxu1 }
 0x103   :  { %v561_v28 = vadd.f32 %v817_v24, %v723_v1  ;;  %v607_v30 = vadd.f32 %v842_v26, %v558_v23  ;;  %v845_v31 = vadd.f32 %v844_v29, %v843_v27 }
 0x105   :  { %v610_v32 = vadd.f32 %v845_v31, %v561_v28 }
 0x107   :  { %v884_v33 = vpop.f32.mrb[8].mxu1 }
 0x108   :  { %v696_v34 = vpop.f32.mrb[9].mxu1 }
 0x109   :  { %v885_v35 = vpop.f32.mrb[10].mxu1 }
 0x10a   :  { %v699_v36 = vpop.f32.mrb[11].mxu1 }
 0x115   :  { %v862_v37 = vpop.f32.mrb[8].mxu0 }
 0x116   :  { %v863_v38 = vpop.f32.mrb[9].mxu0 }
 0x117   :  { %v864_v39 = vadd.f32 %v863_v38, %v862_v37  ;;  %v865_v40 = vpop.f32.mrb[10].mxu0 }
 0x118   :  { %v866_v41 = vpop.f32.mrb[11].mxu0 }
 0x119   :  { %v867_v42 = vadd.f32 %v866_v41, %v865_v40  ;;  %v648_v43 = vadd.f32 %v864_v39, %v599_v14 }
 0x11b   :  { %v697_v44 = vadd.f32 %v696_v34, %v648_v43  ;;  %v651_v45 = vadd.f32 %v867_v42, %v602_v16 }
 0x11d   :  { %v711_v46 = vmax.f32 %v697_v44, 0.0  ;;  %v700_v47 = vadd.f32 %v699_v36, %v651_v45  ;;  %v868_v48 = vpop.f32.mrb[12].mxu0 }
 0x11e   :  { %v869_v49 = vpop.f32.mrb[13].mxu0 }
 0x11f   :  { %715 = vst [vmem:[%s1186_s3] sm:$0xff] %v711_v46  ;;  %v712_v50 = vmax.f32 %v700_v47, 0.0  ;;  %v870_v51 = vadd.f32 %v869_v49, %v868_v48  ;;  %v871_v52 = vpop.f32.mrb[14].mxu0 }
 0x120   :  { %v872_v53 = vpop.f32.mrb[15].mxu0 }
 0x121   :  { %716 = vst [vmem:[%s1186_s3 + $0x8] sm:$0xff] %v712_v50  ;;  %v656_v54 = vadd.f32 %v870_v51, %v607_v30  ;;  %v873_v55 = vadd.f32 %v872_v53, %v871_v52 }
 0x123   :  { %v705_v56 = vadd.f32 %v884_v33, %v656_v54  ;;  %v659_v57 = vadd.f32 %v873_v55, %v610_v32 }
 0x125   :  { %v713_v58 = vmax.f32 %v705_v56, 0.0  ;;  %v708_v59 = vadd.f32 %v885_v35, %v659_v57 }
 0x127   :  { %717 = vst [vmem:[%s1186_s3 + $0x10] sm:$0xff] %v713_v58  ;;  %v714_v60 = vmax.f32 %v708_v59, 0.0 }
 0x129   :  { %718 = vst [vmem:[%s1186_s3 + $0x18] sm:$0xff] %v714_v60 }

// kernel: lnn_forward.8
= control target key start
LH: loop header
LB: loop body
LE: loop exit
PB: predicated region body
PF: predicated region fallthrough
CT: control target
= control target key end

     0   :  { %vm1640_vm0 = vmmov 0   ;;  %vm907_vm1 = vcmask 523264   ;;  %s2036_s1 = inlined_call_operand.vmem [shape: bf16[1600,128], index: 1, kind: input, shape index: {}]   ;;  %s2037_s0 = inlined_call_operand.vmem [shape: bf16[16,1600], index: 0, kind: input, shape index: {}]   ;;  %s2038_s2 = inlined_call_operand.vmem [shape: f32[1,128], index: 2, kind: input, shape index: {}]   ;;  %s2039_s3 = inlined_call_operand.vmem [shape: f32[1,128], index: 3, kind: input, shape index: {}]   ;;  %s2040_s4 = inlined_call_operand.vmem [shape: f32[1,128], index: 4, kind: input, shape index: {}]   ;;  %s2041_s5 = inlined_call_operand.vmem [shape: f32[16,128], index: 5, kind: output, shape index: {}]  }
   0x1   :  { %v1518_v0 = vld [vmem:[%s2036_s1 + $0x40] sm:$0xff]   ;;  %v1522_v4 = vld [vmem:[%s2036_s1 + $0x48] sm:$0xff]   ;;  %v1526_v8 = vld [vmem:[%s2036_s1 + $0x50] sm:$0xff]  }
   0x2   :  { %v1519_v1 = vld [vmem:[%s2036_s1] sm:$0xff]   ;;  %1367 = vmatprep.subr.bf16.mxu0 %v1518_v0  ;;  %v1523_v5 = vld [vmem:[%s2036_s1 + $0x8] sm:$0xff]   ;;  %v1527_v9 = vld [vmem:[%s2036_s1 + $0x10] sm:$0xff]  }
   0x3   :  { %v1520_v2 = vld [vmem:[%s2036_s1 + $0xc0] sm:$0xff]   ;;  %1368 = vmatpush3.bf16.msra.mxu0 %v1519_v1  ;;  %v1524_v6 = vld [vmem:[%s2036_s1 + $0xc8] sm:$0xff]   ;;  %v1528_v10 = vld [vmem:[%s2036_s1 + $0xd0] sm:$0xff]  }
   0x4   :  { %v1521_v3 = vld [vmem:[%s2036_s1 + $0x80] sm:$0xff]   ;;  %1389 = vmatprep.subr.bf16.mxu1 %v1520_v2  ;;  %1369 = vmatprep.subr.bf16.mxu0 %v1522_v4  ;;  %v1525_v7 = vld [vmem:[%s2036_s1 + $0x88] sm:$0xff]   ;;  %v1529_v11 = vld [vmem:[%s2036_s1 + $0x90] sm:$0xff]  }
   0x5   :  { %1390 = vmatpush3.bf16.msra.mxu1 %v1521_v3  ;;  %v1530_v12 = vld [vmem:[%s2036_s1 + $0x58] sm:$0xff]   ;;  %v1534_v16 = vld [vmem:[%s2036_s1 + $0x60] sm:$0xff]   ;;  %v1538_v20 = vld [vmem:[%s2036_s1 + $0x68] sm:$0xff]  }
   0x6   :  { %1391 = vmatprep.subr.bf16.mxu1 %v1524_v6  ;;  %v1531_v13 = vld [vmem:[%s2036_s1 + $0x18] sm:$0xff]   ;;  %v1535_v17 = vld [vmem:[%s2036_s1 + $0x20] sm:$0xff]   ;;  %v1539_v21 = vld [vmem:[%s2036_s1 + $0x28] sm:$0xff]  }
   0x7   :  { %1370 = vmatpush3.bf16.msra.mxu0 %v1523_v5  ;;  %v1532_v14 = vld [vmem:[%s2036_s1 + $0xd8] sm:$0xff]   ;;  %v1536_v18 = vld [vmem:[%s2036_s1 + $0xe0] sm:$0xff]   ;;  %v1540_v22 = vld [vmem:[%s2036_s1 + $0xe8] sm:$0xff]  }
   0x8   :  { %1371 = vmatprep.subr.bf16.mxu0 %v1526_v8  ;;  %v1533_v15 = vld [vmem:[%s2036_s1 + $0x98] sm:$0xff]   ;;  %v1537_v19 = vld [vmem:[%s2036_s1 + $0xa0] sm:$0xff]   ;;  %v1541_v23 = vld [vmem:[%s2036_s1 + $0xa8] sm:$0xff]  }
   0x9   :  { %1392 = vmatpush3.bf16.msra.mxu1 %v1525_v7  ;;  %v1542_v24 = vld [vmem:[%s2036_s1 + $0x70] sm:$0xff]   ;;  %v1546_v28 = vld [vmem:[%s2036_s1 + $0x78] sm:$0xff]   ;;  %v1553_v34 = vld [vmem:[%s2036_s1 + $0x140] sm:$0xff]  }
   0xa   :  { %1393 = vmatprep.subr.bf16.mxu1 %v1528_v10  ;;  %v1543_v25 = vld [vmem:[%s2036_s1 + $0x30] sm:$0xff]   ;;  %v1547_v29 = vld [vmem:[%s2036_s1 + $0x38] sm:$0xff]   ;;  %v1556_v36 = vld [vmem:[%s2037_s0 + $0xc] ss:$52 sps:$4 sm:$0xff]  }
   0xb   :  { %1372 = vmatpush3.bf16.msra.mxu0 %v1527_v9  ;;  %v1544_v26 = vld [vmem:[%s2036_s1 + $0xf0] sm:$0xff]   ;;  %v1548_v30 = vld [vmem:[%s2036_s1 + $0xf8] sm:$0xff]   ;;  %v1557_v37 = vld [vmem:[%s2036_s1 + $0x100] sm:$0xff]   ;;  %984 = vmatprep.mubr.bf16.mxu1 %v1556_v36 }
   0xc   :  { %1373 = vmatprep.subr.bf16.mxu0 %v1530_v12  ;;  %v1545_v27 = vld [vmem:[%s2036_s1 + $0xb0] sm:$0xff]   ;;  %v1551_v32 = vld [vmem:[%s2037_s0 + $0x4] ss:$52 sps:$4 sm:$0xff]   ;;  %v1554_v35 = vld [vmem:[%s2037_s0 + $0x8] ss:$52 sps:$4 sm:$0xff]  }
   0xd   :  { %1394 = vmatpush3.bf16.msra.mxu1 %v1529_v11  ;;  %v1549_v31 = vld [vmem:[%s2037_s0] ss:$52 sps:$4 sm:$0xff]   ;;  %v1552_v33 = vld [vmem:[%s2036_s1 + $0xb8] sm:$0xff]   ;;  %943 = vmatprep.mubr.bf16.mxu0 %v1551_v32  ;;  %v1560_v40 = vld [vmem:[%s2036_s1 + $0x148] sm:$0xff]  }
   0xe   :  { %1395 = vmatprep.subr.bf16.mxu1 %v1532_v14  ;;  %v1558_v38 = vld [vmem:[%s2036_s1 + $0x1c0] sm:$0xff]   ;;  %v1561_v41 = vld [vmem:[%s2036_s1 + $0x108] sm:$0xff]   ;;  %v1564_v44 = vld [vmem:[%s2036_s1 + $0x150] sm:$0xff]  }
   0xf   :  { %1374 = vmatpush3.bf16.msra.mxu0 %v1531_v13  ;;  %v1559_v39 = vld [vmem:[%s2036_s1 + $0x180] sm:$0xff]   ;;  %v1562_v42 = vld [vmem:[%s2036_s1 + $0x1c8] sm:$0xff]   ;;  %v1565_v45 = vld [vmem:[%s2036_s1 + $0x110] sm:$0xff]  }
  0x10   :  { %1375 = vmatprep.subr.bf16.mxu0 %v1534_v16  ;;  %v1563_v43 = vld [vmem:[%s2036_s1 + $0x188] sm:$0xff]   ;;  %v1566_v46 = vld [vmem:[%s2036_s1 + $0x1d0] sm:$0xff]   ;;  %v1568_v48 = vld [vmem:[%s2036_s1 + $0x158] sm:$0xff]  }
  0x11   :  { %1396 = vmatpush3.bf16.msra.mxu1 %v1533_v15  ;;  %v1567_v47 = vld [vmem:[%s2036_s1 + $0x190] sm:$0xff]   ;;  %v1569_v49 = vld [vmem:[%s2036_s1 + $0x118] sm:$0xff]   ;;  %v1572_v52 = vld [vmem:[%s2036_s1 + $0x160] sm:$0xff]  }
  0x12   :  { %1397 = vmatprep.subr.bf16.mxu1 %v1536_v18  ;;  %v1570_v50 = vld [vmem:[%s2036_s1 + $0x1d8] sm:$0xff]   ;;  %v1573_v53 = vld [vmem:[%s2036_s1 + $0x120] sm:$0xff]   ;;  %v1576_v56 = vld [vmem:[%s2036_s1 + $0x168] sm:$0xff]  }
  0x13   :  { %1376 = vmatpush3.bf16.msra.mxu0 %v1535_v17  ;;  %v1571_v51 = vld [vmem:[%s2036_s1 + $0x198] sm:$0xff]   ;;  %v1574_v54 = vld [vmem:[%s2036_s1 + $0x1e0] sm:$0xff]   ;;  %v1577_v57 = vld [vmem:[%s2036_s1 + $0x128] sm:$0xff]  }
  0x14   :  { %1377 = vmatprep.subr.bf16.mxu0 %v1538_v20  ;;  %v1575_v55 = vld [vmem:[%s2036_s1 + $0x1a0] sm:$0xff]   ;;  %v1578_v58 = vld [vmem:[%s2036_s1 + $0x1e8] sm:$0xff]   ;;  %v1580_v60 = vld [vmem:[%s2036_s1 + $0x170] sm:$0xff]  }
  0x15   :  { %1398 = vmatpush3.bf16.msra.mxu1 %v1537_v19  ;;  %v1579_v59 = vld [vmem:[%s2036_s1 + $0x1a8] sm:$0xff]   ;;  %v1581_v61 = vld [vmem:[%s2036_s1 + $0x130] sm:$0xff]   ;;  %v1584_v0 = vld [vmem:[%s2036_s1 + $0x178] sm:$0xff]  }
  0x16   :  { %1399 = vmatprep.subr.bf16.mxu1 %v1540_v22  ;;  %v1582_v62 = vld [vmem:[%s2036_s1 + $0x1f0] sm:$0xff]   ;;  %v1585_v1 = vld [vmem:[%s2036_s1 + $0x138] sm:$0xff]   ;;  %v1591_v6 = vld [vmem:[%s2036_s1 + $0x240] sm:$0xff]  }
  0x17   :  { %1378 = vmatpush3.bf16.msra.mxu0 %v1539_v21  ;;  %v1583_v63 = vld [vmem:[%s2036_s1 + $0x1b0] sm:$0xff]   ;;  %v1586_v2 = vld [vmem:[%s2036_s1 + $0x1f8] sm:$0xff]   ;;  %v1595_v9 = vld [vmem:[%s2036_s1 + $0x200] sm:$0xff]  }
  0x18   :  { %1379 = vmatprep.subr.bf16.mxu0 %v1542_v24  ;;  %v1587_v3 = vld [vmem:[%s2037_s0 + $0x10] ss:$52 sps:$4 sm:$0xff]   ;;  %v1589_v4 = vld [vmem:[%s2037_s0 + $0x14] ss:$52 sps:$4 sm:$0xff]   ;;  %v1590_v5 = vld [vmem:[%s2036_s1 + $0x1b8] sm:$0xff]  }
  0x19   :  { %1400 = vmatpush3.bf16.msra.mxu1 %v1541_v23  ;;  %v1592_v7 = vld [vmem:[%s2037_s0 + $0x18] ss:$52 sps:$4 sm:$0xff]   ;;  %v1594_v8 = vld [vmem:[%s2037_s0 + $0x1c] ss:$52 sps:$4 sm:$0xff]   ;;  %v1596_v10 = vld [vmem:[%s2036_s1 + $0x2c0] sm:$0xff]  }
  0x1a   :  { %1401 = vmatprep.subr.bf16.mxu1 %v1544_v26  ;;  %v1597_v11 = vld [vmem:[%s2036_s1 + $0x280] sm:$0xff]   ;;  %v1598_v12 = vld [vmem:[%s2036_s1 + $0x248] sm:$0xff]   ;;  %v1602_v16 = vld [vmem:[%s2036_s1 + $0x250] sm:$0xff]  }
  0x1b   :  { %1380 = vmatpush3.bf16.msra.mxu0 %v1543_v25  ;;  %v1599_v13 = vld [vmem:[%s2036_s1 + $0x208] sm:$0xff]   ;;  %v1603_v17 = vld [vmem:[%s2036_s1 + $0x210] sm:$0xff]   ;;  %v1606_v20 = vld [vmem:[%s2036_s1 + $0x258] sm:$0xff]  }
  0x1c   :  { %1381 = vmatprep.subr.bf16.mxu0 %v1546_v28  ;;  %v1600_v14 = vld [vmem:[%s2036_s1 + $0x2c8] sm:$0xff]   ;;  %v1604_v18 = vld [vmem:[%s2036_s1 + $0x2d0] sm:$0xff]   ;;  %v1607_v21 = vld [vmem:[%s2036_s1 + $0x218] sm:$0xff]  }
  0x1d   :  { %1402 = vmatpush3.bf16.msra.mxu1 %v1545_v27  ;;  %v1601_v15 = vld [vmem:[%s2036_s1 + $0x288] sm:$0xff]   ;;  %v1605_v19 = vld [vmem:[%s2036_s1 + $0x290] sm:$0xff]   ;;  %v1608_v22 = vld [vmem:[%s2036_s1 + $0x2d8] sm:$0xff]  }
  0x1e   :  { %1403 = vmatprep.subr.bf16.mxu1 %v1548_v30  ;;  %v1609_v23 = vld [vmem:[%s2036_s1 + $0x298] sm:$0xff]   ;;  %v1610_v24 = vld [vmem:[%s2036_s1 + $0x260] sm:$0xff]   ;;  %v1614_v28 = vld [vmem:[%s2036_s1 + $0x268] sm:$0xff]  }
  0x1f   :  { %1382 = vmatpush3.bf16.msra.mxu0 %v1547_v29  ;;  %v1611_v25 = vld [vmem:[%s2036_s1 + $0x220] sm:$0xff]   ;;  %v1615_v29 = vld [vmem:[%s2036_s1 + $0x228] sm:$0xff]   ;;  %v1618_v32 = vld [vmem:[%s2036_s1 + $0x270] sm:$0xff]  }
  0x20   :  { %1411 = vmatprep.subr.bf16.mxu0 %v1553_v34  ;;  %v1612_v26 = vld [vmem:[%s2036_s1 + $0x2e0] sm:$0xff]   ;;  %v1616_v30 = vld [vmem:[%s2036_s1 + $0x2e8] sm:$0xff]   ;;  %v1620_v34 = vld [vmem:[%s2036_s1 + $0x2f0] sm:$0xff]  }
  0x21   :  { %1404 = vmatpush3.bf16.msra.mxu1 %v1552_v33  ;;  %v1613_v27 = vld [vmem:[%s2036_s1 + $0x2a0] sm:$0xff]   ;;  %v1619_v33 = vld [vmem:[%s2036_s1 + $0x230] sm:$0xff]   ;;  %v1622_v36 = vld [vmem:[%s2036_s1 + $0x278] sm:$0xff]  }
  0x22   :  { %944 = vmatmul.mubr.bf16.vlgmr.msra.gmra.mrb[0].mxu0 %v1549_v31  ;;  %1433 = vmatprep.subr.bf16.mxu1 %v1558_v38  ;;  %v1617_v31 = vld [vmem:[%s2036_s1 + $0x2a8] sm:$0xff]   ;;  %v1624_v38 = vld [vmem:[%s2036_s1 + $0x2f8] sm:$0xff]  }
  0x23   :  { %1412 = vmatpush3.bf16.msra.mxu0 %v1557_v37  ;;  %1025 = vmatprep.mubr.bf16.mxu0 %v1589_v4  ;;  %v1623_v37 = vld [vmem:[%s2036_s1 + $0x238] sm:$0xff]  }
  0x24   :  { %985 = vmatmul.mubr.bf16.vlgmr.msra.gmra.mrb[0].mxu1 %v1554_v35  ;;  %1413 = vmatprep.subr.bf16.mxu0 %v1560_v40  ;;  %v1621_v35 = vld [vmem:[%s2036_s1 + $0x2b0] sm:$0xff]   ;;  %v1627_v40 = vld [vmem:[%s2037_s0 + $0x24] ss:$52 sps:$4 sm:$0xff]  }
  0x25   :  { %1434 = vmatpush3.bf16.msra.mxu1 %v1559_v39  ;;  %1066 = vmatprep.mubr.bf16.mxu1 %v1594_v8  ;;  %v1625_v39 = vld [vmem:[%s2037_s0 + $0x20] ss:$52 sps:$4 sm:$0xff]  }
  0x26   :  { %1435 = vmatprep.subr.bf16.mxu1 %v1562_v42  ;;  %v1639_v42 = vmov 0.0  }
  0x27   :  { %1414 = vmatpush3.bf16.msra.mxu0 %v1561_v41  ;;  %v1628_v41 = vld [vmem:[%s2036_s1 + $0x2b8] sm:$0xff]  }
  0x28   :  { %1415 = vmatprep.subr.bf16.mxu0 %v1564_v44  ;;  %v1631_v44 = vld [vmem:[%s2037_s0 + $0x2c] ss:$52 sps:$4 sm:$0xff]  }
  0x29   :  { %1436 = vmatpush3.bf16.msra.mxu1 %v1563_v43  ;;  %v1629_v43 = vld [vmem:[%s2037_s0 + $0x28] ss:$52 sps:$4 sm:$0xff]  }
  0x2a   :  { %1437 = vmatprep.subr.bf16.mxu1 %v1566_v46  ;;  %v1633_v46 = vld [vmem:[%s2036_s1 + $0x308] sm:$0xff]  }
  0x2b   :  { %1416 = vmatpush3.bf16.msra.mxu0 %v1565_v45  ;;  %v1632_v45 = vld [vmem:[%s2036_s1 + $0x300] sm:$0xff]  }
  0x2c   :  { %1417 = vmatprep.subr.bf16.mxu0 %v1568_v48  ;;  %v1635_v48 = vld [vmem:[%s2036_s1 + $0x318] sm:$0xff]  }
  0x2d   :  { %1438 = vmatpush3.bf16.msra.mxu1 %v1567_v47  ;;  %v1634_v47 = vld [vmem:[%s2036_s1 + $0x310] sm:$0xff]  }
  0x2e   :  { %1439 = vmatprep.subr.bf16.mxu1 %v1570_v50  ;;  %v237_v50 = vlaneseq }
  0x2f   :  { %1418 = vmatpush3.bf16.msra.mxu0 %v1569_v49  ;;  %v1636_v49 = vld [vmem:[%s2037_s0 + $0x30] ss:$52 sps:$4 sm:$0xff]  }
  0x30   :  { %1419 = vmatprep.subr.bf16.mxu0 %v1572_v52 }
  0x31   :  { %1440 = vmatpush3.bf16.msra.mxu1 %v1571_v51  ;;  %v238_v51 = vshrl.u32 %v237_v50, 7 }
  0x32   :  { %1441 = vmatprep.subr.bf16.mxu1 %v1574_v54 }
  0x33   :  { %1420 = vmatpush3.bf16.msra.mxu0 %v1573_v53  ;;  %v2010_v52 = vsub.s32 0, %v238_v51  ;;  %v2015_v53 = vld [vmem:[%s2038_s2] sm:$0x1] }
  0x34   :  { %1421 = vmatprep.subr.bf16.mxu0 %v1576_v56 }
  0x35   :  { %1442 = vmatpush3.bf16.msra.mxu1 %v1575_v55  ;;  %v240_v55 = vrot.slane %v2015_v53, %v2010_v52 }
  0x36   :  { %1443 = vmatprep.subr.bf16.mxu1 %v1578_v58 }
  0x37   :  { %1422 = vmatpush3.bf16.msra.mxu0 %v1577_v57 }
  0x38   :  { %1423 = vmatprep.subr.bf16.mxu0 %v1580_v60 }
  0x39   :  { %1444 = vmatpush3.bf16.msra.mxu1 %v1579_v59 }
  0x3a   :  { %1445 = vmatprep.subr.bf16.mxu1 %v1582_v62 }
  0x3b   :  { %1424 = vmatpush3.bf16.msra.mxu0 %v1581_v61 }
  0x3c   :  { %1425 = vmatprep.subr.bf16.mxu0 %v1584_v0 }
  0x3d   :  { %1446 = vmatpush3.bf16.msra.mxu1 %v1583_v63 }
  0x3e   :  { %1447 = vmatprep.subr.bf16.mxu1 %v1586_v2 }
  0x3f   :  { %1426 = vmatpush3.bf16.msra.mxu0 %v1585_v1 }
  0x40   :  { %1455 = vmatprep.subr.bf16.mxu0 %v1591_v6 }
  0x41   :  { %1448 = vmatpush3.bf16.msra.mxu1 %v1590_v5 }
  0x42   :  { %1026 = vmatmul.mubr.bf16.vlgmr.msra.gmra.mrb[4].mxu0 %v1587_v3  ;;  %1477 = vmatprep.subr.bf16.mxu1 %v1596_v10 }
  0x43   :  { %1456 = vmatpush3.bf16.msra.mxu0 %v1595_v9  ;;  %1107 = vmatprep.mubr.bf16.mxu0 %v1627_v40 }
  0x44   :  { %1067 = vmatmul.mubr.bf16.vlgmr.msra.gmra.mrb[4].mxu1 %v1592_v7  ;;  %1457 = vmatprep.subr.bf16.mxu0 %v1598_v12 }
  0x45   :  { %1478 = vmatpush3.bf16.msra.mxu1 %v1597_v11  ;;  %1148 = vmatprep.mubr.bf16.mxu1 %v1631_v44 }
  0x46   :  { %1479 = vmatprep.subr.bf16.mxu1 %v1600_v14 }
  0x47   :  { %1458 = vmatpush3.bf16.msra.mxu0 %v1599_v13 }
  0x48   :  { %1459 = vmatprep.subr.bf16.mxu0 %v1602_v16 }
  0x49   :  { %1480 = vmatpush3.bf16.msra.mxu1 %v1601_v15 }
  0x4a   :  { %1481 = vmatprep.subr.bf16.mxu1 %v1604_v18 }
  0x4b   :  { %1460 = vmatpush3.bf16.msra.mxu0 %v1603_v17 }
  0x4c   :  { %1461 = vmatprep.subr.bf16.mxu0 %v1606_v20 }
  0x4d   :  { %1482 = vmatpush3.bf16.msra.mxu1 %v1605_v19 }
  0x4e   :  { %1483 = vmatprep.subr.bf16.mxu1 %v1608_v22 }
  0x4f   :  { %1462 = vmatpush3.bf16.msra.mxu0 %v1607_v21 }
  0x50   :  { %1463 = vmatprep.subr.bf16.mxu0 %v1610_v24 }
  0x51   :  { %1484 = vmatpush3.bf16.msra.mxu1 %v1609_v23 }
  0x52   :  { %1485 = vmatprep.subr.bf16.mxu1 %v1612_v26 }
  0x53   :  { %1464 = vmatpush3.bf16.msra.mxu0 %v1611_v25 }
  0x54   :  { %1465 = vmatprep.subr.bf16.mxu0 %v1614_v28 }
  0x55   :  { %1486 = vmatpush3.bf16.msra.mxu1 %v1613_v27 }
  0x56   :  { %1487 = vmatprep.subr.bf16.mxu1 %v1616_v30 }
  0x57   :  { %1466 = vmatpush3.bf16.msra.mxu0 %v1615_v29 }
  0x58   :  { %1467 = vmatprep.subr.bf16.mxu0 %v1618_v32 }
  0x59   :  { %1488 = vmatpush3.bf16.msra.mxu1 %v1617_v31 }
  0x5a   :  { %1489 = vmatprep.subr.bf16.mxu1 %v1620_v34 }
  0x5b   :  { %1468 = vmatpush3.bf16.msra.mxu0 %v1619_v33 }
  0x5c   :  { %1469 = vmatprep.subr.bf16.mxu0 %v1622_v36 }
  0x5d   :  { %1490 = vmatpush3.bf16.msra.mxu1 %v1621_v35 }
  0x5e   :  { %1491 = vmatprep.subr.bf16.mxu1 %v1624_v38 }
  0x5f   :  { %1470 = vmatpush3.bf16.msra.mxu0 %v1623_v37 }
  0x60   :  { %1504 = vmatprep.subr.bf16.mxu0 %v1639_v42 }
  0x61   :  { %1492 = vmatpush3.bf16.msra.mxu1 %v1628_v41 }
  0x62   :  { %1108 = vmatmul.mubr.bf16.vlgmr.msra.gmra.mrb[8].mxu0 %v1625_v39 }
  0x63   :  { %1512 = vmatprep.mubr.msk.bf16.mxu0 %vm1640_vm0, %v1639_v42  ;;  %1505 = vmatpush3.bf16.msra.mxu0 %v1632_v45 }
  0x64   :  { %1149 = vmatmul.mubr.bf16.vlgmr.msra.gmra.mrb[8].mxu1 %v1629_v43  ;;  %1506 = vmatprep.subr.bf16.mxu0 %v1639_v42 }
  0x67   :  { %1507 = vmatpush3.bf16.msra.mxu0 %v1633_v46 }
  0x68   :  { %1508 = vmatprep.subr.bf16.mxu0 %v1639_v42 }
  0x6b   :  { %1509 = vmatpush3.bf16.msra.mxu0 %v1634_v47 }
  0x6c   :  { %1510 = vmatprep.subr.bf16.mxu0 %v1639_v42 }
  0x6f   :  { %1511 = vmatpush3.bf16.msra.mxu0 %v1635_v48 }
  0x72   :  { %1513 = vmatmul.mubr.msk.bf16.vlgmr.msra.gmra.mrb[12].mxu0 %vm907_vm1, %v1636_v49 }
  0xf5   :  { %v1383_v54 = vpop.f32.mrb[0].mxu0 }
  0xf6   :  { %v1384_v56 = vpop.f32.mrb[1].mxu0 }
  0xf7   :  { %v1385_v57 = vadd.f32 %v1384_v56, %v1383_v54  ;;  %v1386_v58 = vpop.f32.mrb[2].mxu0  ;;  %v1405_v59 = vpop.f32.mrb[0].mxu1  ;;  %v1216_v56 = vmul.f32 %v2015_v53, %v2015_v53 }
  0xf8   :  { %v1387_v60 = vpop.f32.mrb[3].mxu0  ;;  %v1406_v63 = vpop.f32.mrb[1].mxu1 }
  0xf9   :  { %v946_v61 = vadd.f32 %v1385_v57, %v240_v55  ;;  %v1388_v62 = vadd.f32 %v1387_v60, %v1386_v58  ;;  %v1407_v0 = vadd.f32 %v1406_v63, %v1405_v59  ;;  %v1408_v1 = vpop.f32.mrb[2].mxu1  ;;  %v1205_v59 = vmul.f32 8.0, %v2015_v53 }
  0xfa   :  { %v1409_v3 = vpop.f32.mrb[3].mxu1 }
  0xfb   :  { %v949_v2 = vadd.f32 %v1388_v62, %v240_v55  ;;  %v987_v4 = vadd.f32 %v1407_v0, %v946_v61  ;;  %v1410_v5 = vadd.f32 %v1409_v3, %v1408_v1  ;;  %v1217_v62 = vmul.f32 8.0, %v1216_v56 }
  0xfd   :  { %v990_v6 = vadd.f32 %v1410_v5, %v949_v2 }
 0x115   :  { %v1427_v7 = vpop.f32.mrb[4].mxu0 }
 0x116   :  { %v1428_v8 = vpop.f32.mrb[5].mxu0 }
 0x117   :  { %v1429_v9 = vadd.f32 %v1428_v8, %v1427_v7  ;;  %v1430_v10 = vpop.f32.mrb[6].mxu0  ;;  %v1449_v13 = vpop.f32.mrb[4].mxu1 }
 0x118   :  { %v1431_v11 = vpop.f32.mrb[7].mxu0  ;;  %v1450_v15 = vpop.f32.mrb[5].mxu1 }
 0x119   :  { %v1028_v12 = vadd.f32 %v1429_v9, %v987_v4  ;;  %v1432_v14 = vadd.f32 %v1431_v11, %v1430_v10  ;;  %v1451_v17 = vadd.f32 %v1450_v15, %v1449_v13  ;;  %v1452_v18 = vpop.f32.mrb[6].mxu1  ;;  %v1226_v10 = vld [vmem:[%s2039_s3] sm:$0x1] }
 0x11a   :  { %v1453_v19 = vpop.f32.mrb[7].mxu1 }
 0x11b   :  { %v1031_v16 = vadd.f32 %v1432_v14, %v990_v6  ;;  %v1069_v20 = vadd.f32 %v1451_v17, %v1028_v12  ;;  %v1454_v21 = vadd.f32 %v1453_v19, %v1452_v18  ;;  %v1228_v12 = vld [vmem:[%s2040_s4] sm:$0x1] }
 0x11d   :  { %v1072_v22 = vadd.f32 %v1454_v21, %v1031_v16 }
 0x135   :  { %v1471_v23 = vpop.f32.mrb[8].mxu0 }
 0x136   :  { %v1472_v24 = vpop.f32.mrb[9].mxu0 }
 0x137   :  { %v1473_v25 = vadd.f32 %v1472_v24, %v1471_v23  ;;  %v1474_v26 = vpop.f32.mrb[10].mxu0  ;;  %v1493_v27 = vpop.f32.mrb[8].mxu1 }
 0x138   :  { %v1475_v28 = vpop.f32.mrb[11].mxu0  ;;  %v1494_v31 = vpop.f32.mrb[9].mxu1 }
 0x139   :  { %v1110_v29 = vadd.f32 %v1473_v25, %v1069_v20  ;;  %v1476_v30 = vadd.f32 %v1475_v28, %v1474_v26  ;;  %v1495_v32 = vadd.f32 %v1494_v31, %v1493_v27  ;;  %v1496_v33 = vpop.f32.mrb[10].mxu1 }
 0x13a   :  { %v1497_v35 = vpop.f32.mrb[11].mxu1 }
 0x13b   :  { %v1113_v34 = vadd.f32 %v1476_v30, %v1072_v22  ;;  %v1498_v36 = vadd.f32 %v1497_v35, %v1496_v33  ;;  %v1151_v37 = vadd.f32 %v1495_v32, %v1110_v29 }
 0x13d   :  { %v1154_v38 = vadd.f32 %v1498_v36, %v1113_v34 }
 0x145   :  { %v1191_v39 = vpop.f32.mrb[12].mxu0 }
 0x146   :  { %v1192_v40 = vadd.f32 %v1191_v39, %v1151_v37  ;;  %v1514_v41 = vpop.f32.mrb[13].mxu0 }
 0x147   :  { %v1194_v42 = vpop.f32.mrb[14].mxu0 }
 0x148   :  { %v1195_v43 = vadd.f32 %v1194_v42, %v1154_v38  ;;  %v1515_v44 = vpop.f32.mrb[15].mxu0  ;;  %v1207_v45 = vmul.f32 %v1192_v40, %v1192_v40 }
 0x14a   :  { %v1198_v46 = vadd.f32 %v1195_v43, %v1192_v40  ;;  %v1208_v47 = vmul.f32 %v1195_v43, %v1195_v43 }
 0x14c   :  { %v1199_v48 = vrot.slane %v1198_v46, 4  ;;  %v1209_v49 = vadd.f32 %v1208_v47, %v1207_v45 }
 0x14e   :  { %v1200_v50 = vadd.f32 %v1199_v48, %v1198_v46  ;;  %v1210_v51 = vrot.slane %v1209_v49, 4 }
 0x150   :  { %v1201_v54 = vrot.slane %v1200_v50, 2  ;;  %v1211_v55 = vadd.f32 %v1210_v51, %v1209_v49 }
 0x152   :  { %v1202_v57 = vadd.f32 %v1201_v54, %v1200_v50  ;;  %v1212_v58 = vrot.slane %v1211_v55, 2 }
 0x154   :  { %v1203_v60 = vrot.slane %v1202_v57, 1  ;;  %v1213_v61 = vadd.f32 %v1212_v58, %v1211_v55 }
 0x156   :  { %v1204_v63 = vadd.f32 %v1203_v60, %v1202_v57  ;;  %v1214_v0 = vrot.slane %v1213_v61, 1 }
 0x158   :  { %v1206_v1 = vsub.f32 %v1204_v63, %v1205_v59  ;;  %v1215_v2 = vadd.f32 %v1214_v0, %v1213_v61 }
 0x15a   :  { %v1218_v3 = vsub.f32 %v1215_v2, %v1217_v62  ;;  %v1219_v4 = vmul.f32 0.125, %v1206_v1 }
 0x15c   :  { %v1220_v5 = vmul.f32 0.125, %v1218_v3  ;;  %v1221_v6 = vmul.f32 %v1219_v4, %v1219_v4 }
 0x15e   :  { %v1222_v7 = vsub.f32 %v1220_v5, %v1221_v6 }
 0x160   :  { %v1223_v8 = vmax.f32 %v1222_v7, 0.0 }
 0x162   :  { %v1224_v9 = vadd.f32 1e-05, %v1223_v8 }
 0x164   :  { %1637 = vrsqrt.f32 %v1224_v9 }
 0x16e   :  { %v1638_v53 = vpop.eup %1637 }
 0x16f   :  { %v1227_v11 = vmul.f32 %v1638_v53, %v1226_v10 }
 0x171   :  { %v1229_v13 = vmul.f32 %v1227_v11, %v1219_v4  ;;  %v1234_v14 = vrot.slane %v1227_v11, %v2010_v52 }
 0x173   :  { %v1230_v15 = vsub.f32 %v1228_v12, %v1229_v13  ;;  %v1235_v16 = vmul.f32 %v1234_v14, %v1192_v40  ;;  %v1236_v17 = vmul.f32 %v1234_v14, %v1195_v43 }
 0x175   :  { %v1241_v18 = vrot.slane %v1230_v15, %v2010_v52 }
 0x177   :  { %v1243_v19 = vadd.f32 %v1241_v18, %v1235_v16  ;;  %v1244_v20 = vadd.f32 %v1241_v18, %v1236_v17 }
 0x179   :  { %v1245_v21 = vmax.f32 %v1243_v19, 0.0  ;;  %v1246_v22 = vmax.f32 %v1244_v20, 0.0 }
 0x17b   :  { %1247 = vst [vmem:[%s2041_s5] sm:$0xff] %v1245_v21  ;;  %1248 = vst [vmem:[%s2041_s5 + $0x8] sm:$0xff] %v1246_v22 }

// kernel: lnn_forward.9
= control target key start
LH: loop header
LB: loop body
LE: loop exit
PB: predicated region body
PF: predicated region fallthrough
CT: control target
= control target key end

     0   :  { %v687_v1 = vmov 0.0   ;;  %vm688_vm0 = vmmov 0   ;;  %vm69_vm1 = vcmask 261120   ;;  %v689_v7 = vmov 0   ;;  %s691_s27 = smov 64   ;;  %s821_s1 = inlined_call_operand.vmem [shape: bf16[32,128], index: 1, kind: input, shape index: {}]   ;;  %s822_s3 = inlined_call_operand.vmem [shape: bf16[32,128], index: 3, kind: input, shape index: {}]   ;;  %s823_s0 = inlined_call_operand.vmem [shape: bf16[64,32], index: 0, kind: input, shape index: {}]   ;;  %s824_s2 = inlined_call_operand.vmem [shape: f32[1,128], index: 2, kind: input, shape index: {}]   ;;  %s825_s4 = inlined_call_operand.vmem [shape: f32[16,32], index: 4, kind: output, shape index: {}]  }
   0x1   :  { %v631_v0 = vld [vmem:[%s821_s1] sm:$0xff]   ;;  %594 = vmatprep.subr.bf16.mxu1 %v687_v1  ;;  %598 = vmatprep.mubr.msk.bf16.mxu1 %vm688_vm0, %v687_v1  ;;  %v633_v3 = vld [vmem:[%s821_s1 + $0x8] sm:$0xff]   ;;  %v637_v62 = vld [vmem:[%s823_s0 + $0x10] sm:$0xff]  }
   0x2   :  { %v726_v2 = vld [vmem:[%s822_s3] sm:$0xff]   ;;  %582 = vmatprep.subr.bf16.mxu0 %v631_v0  ;;  %v735_v4 = vld [vmem:[%s822_s3 + $0x8] sm:$0xff]   ;;  %v638_v63 = vld [vmem:[%s823_s0 + $0x18] sm:$0xff]  }
   0x3   :  { %583 = vmatpush3.bf16.msra.mxu0 %v631_v0  ;;  %595 = vmatpush3.bf16.msra.mxu1 %v726_v2  ;;  %v635_v5 = vld [vmem:[%s823_s0] sm:$0xff]   ;;  %v636_v6 = vld [vmem:[%s823_s0 + $0x8] sm:$0xff]  }
   0x4   :  { %584 = vmatprep.subr.bf16.mxu0 %v633_v3  ;;  %596 = vmatprep.subr.bf16.mxu1 %v687_v1  ;;  %v761_v8 = vld [vmem:[%s824_s2] ss:$0 sm:$0xff]  ;;  %s690_s2 = smov 32  }
   0x5   :  { %586 = vmatprep.mubr.msk.bf16.mxu0 %vm69_vm1, %v635_v5 }
   0x7   :  { %585 = vmatpush3.bf16.msra.mxu0 %v633_v3  ;;  %597 = vmatpush3.bf16.msra.mxu1 %v735_v4 }
   0x8   :  { %602 = vmatprep.subr.bf16.mxu1 %v687_v1  ;;  %610 = vmatprep.subr.bf16.mxu0 %v687_v1 }
   0xa   :  { %587 = vmatmul.mubr.msk.bf16.vlgmr.msra.gmra.mrb[0].mxu0 %vm69_vm1, %v636_v6  ;;  %599 = vmatmul.mubr.bf16.vlgmr.msra.gmra.mrb[0].mxu1 %v689_v7 }
   0xb   :  { %603 = vmatpush3.bf16.msra.mxu1 %v726_v2  ;;  %606 = vmatprep.mubr.msk.bf16.mxu1 %vm688_vm0, %v687_v1 }
   0xc   :  { %604 = vmatprep.subr.bf16.mxu1 %v687_v1  ;;  %611 = vmatpush3.bf16.msra.mxu0 %v726_v2 }
   0xd   :  { %612 = vmatprep.subr.bf16.mxu0 %v687_v1  ;;  %590 = vmatprep.mubr.msk.bf16.mxu0 %vm69_vm1, %v637_v62 }
   0xf   :  { %605 = vmatpush3.bf16.msra.mxu1 %v735_v4 }
  0x10   :  { %613 = vmatpush3.bf16.msra.mxu0 %v735_v4  ;;  %618 = vmatprep.subr.bf16.mxu1 %v687_v1 }
  0x12   :  { %591 = vmatmul.mubr.msk.bf16.gmra.mrb[4].mxu0 %vm69_vm1, %v638_v63 }
  0x13   :  { %614 = vmatprep.mubr.msk.bf16.mxu0 %vm688_vm0, %v687_v1 }
  0xdd   :  { %v588_v9 = vpop.f32.mrb[0].mxu0  ;;  %v200_v10 = vpop.f32.mrb[0].mxu1 }
  0xde   :  { %v116_v11 = vpop.f32.mrb[1].mxu0  ;;  %v600_v12 = vpop.f32.mrb[1].mxu1  ;;  %v125_v46 = vadd.f32 %v588_v9, %v761_v8 }
  0xdf   :  { %v117_v13 = vadd.f32 %v761_v8, %v116_v11  ;;  %v589_v14 = vpop.f32.mrb[2].mxu0  ;;  %v203_v15 = vpop.f32.mrb[2].mxu1 }
  0xe0   :  { %v119_v16 = vpop.f32.mrb[3].mxu0  ;;  %v601_v17 = vpop.f32.mrb[3].mxu1  ;;  %v128_v48 = vadd.f32 %v589_v14, %v761_v8 }
  0xe1   :  { %v207_v18 = vadd.f32 %v200_v10, %v117_v13  ;;  %v120_v19 = vadd.f32 %v761_v8, %v119_v16 }
  0xe3   :  { %639 = vtanh.f32 %v207_v18  ;;  %v553_v20 = vmul.f32 -1.442695, %v207_v18  ;;  %v208_v21 = vadd.f32 %v203_v15, %v120_v19 }
  0xe5   :  { %641 = vpow2.f32 %v553_v20  ;;  %v554_v22 = vmul.f32 -1.442695, %v208_v21  ;;  %v592_v10 = vpop.f32.mrb[4].mxu0 }
  0xe6   :  { %643 = vtanh.f32 %v208_v21  ;;  %v132_v11 = vpop.f32.mrb[5].mxu0 }
  0xe7   :  { %645 = vpow2.f32 %v554_v22  ;;  %v593_v12 = vpop.f32.mrb[6].mxu0  ;;  %v133_v22 = vadd.f32 %v761_v8, %v132_v11 }
  0xed   :  { %v640_v23 = vpop.eup %639 }
  0xee   :  { %237 = vrot.lane.b32.xlu0 %v640_v23, %s690_s2 }
  0xef   :  { %v642_v24 = vpop.eup %641 }
  0xf0   :  { %v644_v25 = vpop.eup %643  ;;  %v217_v26 = vadd.f32 1.0, %v642_v24 }
  0xf1   :  { %v646_v27 = vpop.eup %645 }
  0xf2   :  { %647 = vrcp.f32 %v217_v26  ;;  %v218_v28 = vadd.f32 1.0, %v646_v27  ;;  %239 = vrot.lane.b32.xlu0 %v644_v25, %s690_s2 }
  0xf4   :  { %649 = vrcp.f32 %v218_v28 }
  0xfc   :  { %v648_v29 = vpop.eup %647 }
  0xfd   :  { %v223_v30 = vsub.f32 1.0, %v648_v29 }
  0xfe   :  { %v650_v31 = vpop.eup %649 }
  0xff   :  { %227 = vrot.lane.b32.xlu1 %v223_v30, %s691_s27  ;;  %v224_v32 = vsub.f32 1.0, %v650_v31 }
 0x103   :  { %229 = vrot.lane.b32.xlu1 %v224_v32, %s691_s27 }
 0x160   :  { %v238_v33 = vpop.permute.xlu0 %237 }
 0x161   :  { %v243_v34 = vmul.f32 %v648_v29, %v238_v33 }
 0x163   :  { %247 = vrot.lane.b32.xlu0 %v243_v34, %s691_s27 }
 0x164   :  { %v240_v35 = vpop.permute.xlu0 %239 }
 0x165   :  { %v244_v36 = vmul.f32 %v650_v31, %v240_v35 }
 0x167   :  { %249 = vrot.lane.b32.xlu1 %v244_v36, %s691_s27 }
 0x171   :  { %v228_v37 = vpop.permute.xlu1 %227 }
 0x172   :  { %v233_v40 = vmul.f32 %v640_v23, %v228_v37 }
 0x175   :  { %v230_v38 = vpop.permute.xlu1 %229 }
 0x176   :  { %v234_v41 = vmul.f32 %v644_v25, %v230_v38 }
 0x1d5   :  { %v248_v39 = vpop.permute.xlu0 %247 }
 0x1d6   :  { %v253_v43 = vadd.f32 %v248_v39, %v233_v40 }
 0x1d9   :  { %v250_v42 = vpop.permute.xlu1 %249 }
 0x1da   :  { %v254_v44 = vadd.f32 %v250_v42, %v234_v41 }
 0x1dc   :  { %v255_v45 = vpack.c.bf16 %v254_v44, %v253_v43 }
 0x1de   :  { %607 = vmatmul.mubr.msk.bf16.vlgmr.msra.gmra.mrb[4].mxu1 %vm69_vm1, %v255_v45 }
 0x1df   :  { %619 = vmatpush3.bf16.msra.mxu1 %v726_v2  ;;  %622 = vmatprep.mubr.msk.bf16.mxu1 %vm688_vm0, %v687_v1 }
 0x1e0   :  { %620 = vmatprep.subr.bf16.mxu1 %v687_v1  ;;  %v135_v1 = vpop.f32.mrb[7].mxu0 }
 0x1e1   :  { %v136_v24 = vadd.f32 %v761_v8, %v135_v1 }
 0x1e3   :  { %621 = vmatpush3.bf16.msra.mxu1 %v735_v4 }
 0x2b1   :  { %v293_v47 = vpop.f32.mrb[4].mxu1 }
 0x2b2   :  { %v300_v49 = vadd.f32 %v293_v47, %v125_v46  ;;  %v608_v50 = vpop.f32.mrb[5].mxu1 }
 0x2b3   :  { %v296_v51 = vpop.f32.mrb[6].mxu1 }
 0x2b4   :  { %651 = vtanh.f32 %v300_v49  ;;  %v556_v52 = vmul.f32 -1.442695, %v300_v49  ;;  %v301_v53 = vadd.f32 %v296_v51, %v128_v48  ;;  %v609_v54 = vpop.f32.mrb[7].mxu1 }
 0x2b6   :  { %653 = vpow2.f32 %v556_v52  ;;  %v557_v55 = vmul.f32 -1.442695, %v301_v53 }
 0x2b7   :  { %655 = vtanh.f32 %v301_v53 }
 0x2b8   :  { %657 = vpow2.f32 %v557_v55  ;;  %v141_v55 = vadd.f32 %v592_v10, %v761_v8 }
 0x2be   :  { %v652_v56 = vpop.eup %651 }
 0x2bf   :  { %330 = vrot.lane.b32.xlu0 %v652_v56, %s690_s2 }
 0x2c0   :  { %v654_v57 = vpop.eup %653 }
 0x2c1   :  { %v656_v58 = vpop.eup %655  ;;  %v310_v59 = vadd.f32 1.0, %v654_v57  ;;  %v144_v57 = vadd.f32 %v593_v12, %v761_v8 }
 0x2c2   :  { %v658_v60 = vpop.eup %657  ;;  %332 = vrot.lane.b32.xlu1 %v656_v58, %s690_s2 }
 0x2c3   :  { %659 = vrcp.f32 %v310_v59  ;;  %v311_v61 = vadd.f32 1.0, %v658_v60 }
 0x2c5   :  { %661 = vrcp.f32 %v311_v61 }
 0x2cd   :  { %v660_v0 = vpop.eup %659 }
 0x2ce   :  { %v316_v2 = vsub.f32 1.0, %v660_v0 }
 0x2cf   :  { %v662_v3 = vpop.eup %661 }
 0x2d0   :  { %320 = vrot.lane.b32.xlu0 %v316_v2, %s691_s27  ;;  %v317_v4 = vsub.f32 1.0, %v662_v3 }
 0x2d2   :  { %322 = vrot.lane.b32.xlu1 %v317_v4, %s691_s27 }
 0x331   :  { %v331_v5 = vpop.permute.xlu0 %330 }
 0x332   :  { %v336_v6 = vmul.f32 %v660_v0, %v331_v5 }
 0x334   :  { %v333_v7 = vpop.permute.xlu1 %332  ;;  %340 = vrot.lane.b32.xlu0 %v336_v6, %s691_s27 }
 0x335   :  { %v337_v9 = vmul.f32 %v662_v3, %v333_v7 }
 0x337   :  { %342 = vrot.lane.b32.xlu1 %v337_v9, %s691_s27 }
 0x342   :  { %v321_v13 = vpop.permute.xlu0 %320 }
 0x343   :  { %v326_v16 = vmul.f32 %v652_v56, %v321_v13 }
 0x344   :  { %v323_v14 = vpop.permute.xlu1 %322 }
 0x345   :  { %v327_v17 = vmul.f32 %v656_v58, %v323_v14 }
 0x3a6   :  { %v341_v15 = vpop.permute.xlu0 %340 }
 0x3a7   :  { %v346_v19 = vadd.f32 %v341_v15, %v326_v16 }
 0x3a9   :  { %v343_v18 = vpop.permute.xlu1 %342 }
 0x3aa   :  { %v347_v20 = vadd.f32 %v343_v18, %v327_v17 }
 0x3ac   :  { %v348_v21 = vpack.c.bf16 %v347_v20, %v346_v19 }
 0x3ae   :  { %615 = vmatmul.mubr.msk.bf16.vlgmr.msra.gmra.mrb[8].mxu0 %vm69_vm1, %v348_v21 }
 0x481   :  { %v386_v23 = vpop.f32.mrb[8].mxu0 }
 0x482   :  { %v393_v25 = vadd.f32 %v386_v23, %v133_v22  ;;  %v616_v26 = vpop.f32.mrb[9].mxu0 }
 0x483   :  { %v389_v27 = vpop.f32.mrb[10].mxu0 }
 0x484   :  { %663 = vtanh.f32 %v393_v25  ;;  %v559_v28 = vmul.f32 -1.442695, %v393_v25  ;;  %v394_v29 = vadd.f32 %v389_v27, %v136_v24  ;;  %v617_v30 = vpop.f32.mrb[11].mxu0 }
 0x486   :  { %665 = vpow2.f32 %v559_v28  ;;  %v560_v31 = vmul.f32 -1.442695, %v394_v29 }
 0x487   :  { %667 = vtanh.f32 %v394_v29 }
 0x488   :  { %669 = vpow2.f32 %v560_v31 }
 0x48e   :  { %v664_v32 = vpop.eup %663 }
 0x48f   :  { %423 = vrot.lane.b32.xlu0 %v664_v32, %s690_s2 }
 0x490   :  { %v666_v33 = vpop.eup %665 }
 0x491   :  { %v668_v34 = vpop.eup %667  ;;  %v403_v35 = vadd.f32 1.0, %v666_v33 }
 0x492   :  { %v670_v36 = vpop.eup %669  ;;  %425 = vrot.lane.b32.xlu1 %v668_v34, %s690_s2 }
 0x493   :  { %671 = vrcp.f32 %v403_v35  ;;  %v404_v37 = vadd.f32 1.0, %v670_v36 }
 0x495   :  { %673 = vrcp.f32 %v404_v37 }
 0x49d   :  { %v672_v38 = vpop.eup %671 }
 0x49e   :  { %v409_v39 = vsub.f32 1.0, %v672_v38 }
 0x49f   :  { %v674_v40 = vpop.eup %673 }
 0x4a0   :  { %413 = vrot.lane.b32.xlu0 %v409_v39, %s691_s27  ;;  %v410_v41 = vsub.f32 1.0, %v674_v40 }
 0x4a2   :  { %415 = vrot.lane.b32.xlu1 %v410_v41, %s691_s27 }
 0x501   :  { %v424_v42 = vpop.permute.xlu0 %423 }
 0x502   :  { %v429_v43 = vmul.f32 %v672_v38, %v424_v42 }
 0x504   :  { %v426_v44 = vpop.permute.xlu1 %425  ;;  %433 = vrot.lane.b32.xlu0 %v429_v43, %s691_s27 }
 0x505   :  { %v430_v45 = vmul.f32 %v674_v40, %v426_v44 }
 0x507   :  { %435 = vrot.lane.b32.xlu1 %v430_v45, %s691_s27 }
 0x512   :  { %v414_v46 = vpop.permute.xlu0 %413 }
 0x513   :  { %v419_v49 = vmul.f32 %v664_v32, %v414_v46 }
 0x514   :  { %v416_v47 = vpop.permute.xlu1 %415 }
 0x515   :  { %v420_v50 = vmul.f32 %v668_v34, %v416_v47 }
 0x576   :  { %v434_v48 = vpop.permute.xlu0 %433 }
 0x577   :  { %v439_v52 = vadd.f32 %v434_v48, %v419_v49 }
 0x579   :  { %v436_v51 = vpop.permute.xlu1 %435 }
 0x57a   :  { %v440_v53 = vadd.f32 %v436_v51, %v420_v50 }
 0x57c   :  { %v441_v54 = vpack.c.bf16 %v440_v53, %v439_v52 }
 0x57e   :  { %623 = vmatmul.mubr.msk.bf16.vlgmr.msra.gmra.mrb[8].mxu1 %vm69_vm1, %v441_v54 }
 0x651   :  { %v479_v56 = vpop.f32.mrb[8].mxu1 }
 0x652   :  { %v486_v58 = vadd.f32 %v479_v56, %v141_v55  ;;  %v624_v59 = vpop.f32.mrb[9].mxu1 }
 0x653   :  { %v482_v60 = vpop.f32.mrb[10].mxu1 }
 0x654   :  { %675 = vtanh.f32 %v486_v58  ;;  %v562_v61 = vmul.f32 -1.442695, %v486_v58  ;;  %v487_v62 = vadd.f32 %v482_v60, %v144_v57  ;;  %v625_v63 = vpop.f32.mrb[11].mxu1 }
 0x656   :  { %677 = vpow2.f32 %v562_v61  ;;  %v563_v0 = vmul.f32 -1.442695, %v487_v62 }
 0x657   :  { %679 = vtanh.f32 %v487_v62 }
 0x658   :  { %681 = vpow2.f32 %v563_v0 }
 0x65e   :  { %v676_v2 = vpop.eup %675 }
 0x65f   :  { %516 = vrot.lane.b32.xlu0 %v676_v2, %s690_s2 }
 0x660   :  { %v678_v3 = vpop.eup %677 }
 0x661   :  { %v680_v4 = vpop.eup %679  ;;  %v496_v5 = vadd.f32 1.0, %v678_v3 }
 0x662   :  { %v682_v6 = vpop.eup %681  ;;  %518 = vrot.lane.b32.xlu1 %v680_v4, %s690_s2 }
 0x663   :  { %683 = vrcp.f32 %v496_v5  ;;  %v497_v8 = vadd.f32 1.0, %v682_v6 }
 0x665   :  { %685 = vrcp.f32 %v497_v8 }
 0x66d   :  { %v684_v7 = vpop.eup %683 }
 0x66e   :  { %v502_v9 = vsub.f32 1.0, %v684_v7 }
 0x66f   :  { %v686_v10 = vpop.eup %685 }
 0x670   :  { %506 = vrot.lane.b32.xlu0 %v502_v9, %s691_s27  ;;  %v503_v11 = vsub.f32 1.0, %v686_v10 }
 0x672   :  { %508 = vrot.lane.b32.xlu1 %v503_v11, %s691_s27 }
 0x6d1   :  { %v517_v12 = vpop.permute.xlu0 %516 }
 0x6d2   :  { %v522_v1 = vmul.f32 %v684_v7, %v517_v12 }
 0x6d4   :  { %v519_v13 = vpop.permute.xlu1 %518  ;;  %526 = vrot.lane.b32.xlu0 %v522_v1, %s691_s27 }
 0x6d5   :  { %v523_v14 = vmul.f32 %v686_v10, %v519_v13 }
 0x6d7   :  { %528 = vrot.lane.b32.xlu1 %v523_v14, %s691_s27 }
 0x6e2   :  { %v507_v15 = vpop.permute.xlu0 %506 }
 0x6e3   :  { %v512_v16 = vmul.f32 %v676_v2, %v507_v15 }
 0x6e4   :  { %v509_v17 = vpop.permute.xlu1 %508 }
 0x6e5   :  { %v513_v20 = vmul.f32 %v680_v4, %v509_v17 }
 0x746   :  { %v527_v18 = vpop.permute.xlu0 %526 }
 0x747   :  { %v532_v19 = vadd.f32 %v527_v18, %v512_v16 }
 0x749   :  { %534 = vst.msk [vmem:[%s825_s4] sm:$0xff] %vm69_vm1, %v532_v19  ;;  %v529_v21 = vpop.permute.xlu1 %528 }
 0x74a   :  { %v533_v22 = vadd.f32 %v529_v21, %v513_v20 }
 0x74c   :  { %535 = vst.msk [vmem:[%s825_s4 + $0x8] sm:$0xff] %vm69_vm1, %v533_v22 }

</bundles_post_ra>
